<compile_context>
chip_gen: v7x
topology: tpu7x:2x2x1
jax: 0.10.0
libtpu: 0.0.40
codegen_flags: <defaults>
</compile_context>

<pallas_src>
import functools

import jax
import jax.numpy as jnp
from jax import lax
from jax.experimental import pallas as pl
from jax.experimental.pallas import tpu as pltpu


def _deconv_kernel(xp_ref, w_ref, b_ref, y_ref, st_ref, *, kH, kW, H_out, W_out):
    """Per-sample transposed conv as a correlation on the dilated input.

    xp_ref: (1, Hp, Wp, C_in)      dilated + padded input (channels on lanes)
    w_ref : (kH*kW, C_out, C_in)   flipped weights, one (C_out, C_in) per tap
    b_ref : (C_out, 1)             bias
    y_ref : (1, C_out, H_out*W_out) deconv + bias output (lane-dense)
    st_ref: (1, C_out, 2)          per-sample [sum, sum of squares] per channel
    """
    xp = xp_ref[0]                                        # (Hp, Wp, C_in)
    c_out = w_ref.shape[1]
    hw = H_out * W_out

    acc = jnp.zeros((c_out, hw), dtype=jnp.float32)
    for kh in range(kH):
        for kw in range(kW):
            win = xp[kh:kh + H_out, kw:kw + W_out, :]     # (H_out, W_out, C_in)
            # Collapse the leading spatial dims; keeps the lane (C_in) dim, so
            # this is a layout-trivial shape cast when W_out % 8 == 0.
            winf = win.reshape(hw, win.shape[-1])         # (H_out*W_out, C_in)
            wk = w_ref[kh * kW + kw]                      # (C_out, C_in)
            # result[co, p] = sum_ci wk[co, ci] * winf[p, ci]   (A @ B^T on MXU)
            acc = acc + lax.dot_general(
                wk, winf,
                dimension_numbers=(((1,), (1,)), ((), ())),
                preferred_element_type=jnp.float32)

    acc = acc + b_ref[...]                                # (C_out, 1) broadcast
    y_ref[0] = acc

    s1 = jnp.sum(acc, axis=1, keepdims=True)              # (C_out, 1)
    s2 = jnp.sum(acc * acc, axis=1, keepdims=True)        # (C_out, 1)
    st_ref[0] = jnp.concatenate([s1, s2], axis=1)         # (C_out, 2)


def _bn_relu_kernel(y_ref, scale_ref, shift_ref, o_ref):
    """Fused BatchNorm affine (precomputed per-channel scale/shift) + ReLU."""
    o_ref[0] = jnp.maximum(y_ref[0] * scale_ref[...] + shift_ref[...], 0.0)


@functools.partial(jax.jit, static_argnames=("stride", "padding"))
def deconv2d_batchnorm_relu(x, weight, bias, gamma, beta, *, stride, padding):
    """Forward of deconv2DBatchNormRelu.

    x      : (N, C_in, H, W)         NCHW, as the PyTorch module
    weight : (C_in, C_out, kH, kW)   PyTorch ConvTranspose2d weight layout
    bias   : (C_out,)
    gamma, beta : (C_out,)           BatchNorm2d affine parameters
    """
    eps = 1e-5                                            # torch BatchNorm2d default
    N, C_in, H, W = x.shape
    wc_in, C_out, kH, kW = weight.shape
    assert wc_in == C_in, "weight / input channel mismatch"

    H_out = (H - 1) * stride - 2 * padding + kH
    W_out = (W - 1) * stride - 2 * padding + kW
    assert H_out > 0 and W_out > 0
    Hp = H_out + kH - 1
    Wp = W_out + kW - 1
    HWo = H_out * W_out
    K = kH * kW

    # ---- glue: dilate + pad the (small) input, flip/flatten the weights ----
    xf = jnp.transpose(x.astype(jnp.float32), (0, 2, 3, 1))        # (N, H, W, C_in)
    pad_h = kH - 1 - padding
    pad_w = kW - 1 - padding
    xp = lax.pad(xf, jnp.array(0.0, dtype=jnp.float32),
                 ((0, 0, 0),
                  (pad_h, pad_h, stride - 1),
                  (pad_w, pad_w, stride - 1),
                  (0, 0, 0)))                                      # (N, Hp, Wp, C_in)

    w_flip = weight.astype(jnp.float32)[:, :, ::-1, ::-1]          # (C_in, C_out, kH, kW)
    w_eff = jnp.transpose(w_flip, (2, 3, 1, 0)).reshape(K, C_out, C_in)
    b_col = bias.astype(jnp.float32).reshape(C_out, 1)

    kernel_a = functools.partial(_deconv_kernel, kH=kH, kW=kW,
                                 H_out=H_out, W_out=W_out)
    y, stats = pl.pallas_call(
        kernel_a,
        out_shape=(jax.ShapeDtypeStruct((N, C_out, HWo), jnp.float32),
                   jax.ShapeDtypeStruct((N, C_out, 2), jnp.float32)),
        grid_spec=pltpu.PrefetchScalarGridSpec(
            num_scalar_prefetch=0,
            grid=(N,),
            in_specs=[
                pl.BlockSpec((1, Hp, Wp, C_in), lambda n: (n, 0, 0, 0)),
                pl.BlockSpec((K, C_out, C_in), lambda n: (0, 0, 0)),
                pl.BlockSpec((C_out, 1), lambda n: (0, 0)),
            ],
            out_specs=[
                pl.BlockSpec((1, C_out, HWo), lambda n: (n, 0, 0)),
                pl.BlockSpec((1, C_out, 2), lambda n: (n, 0, 0)),
            ],
        ),
        compiler_params=pltpu.CompilerParams(
            dimension_semantics=("parallel",)),
    )(xp, w_eff, b_col)

    # ---- glue: BatchNorm batch statistics (training-mode, biased variance) --
    cnt = jnp.float32(N * HWo)
    mean = jnp.sum(stats[:, :, 0], axis=0) / cnt                   # (C_out,)
    var = jnp.maximum(jnp.sum(stats[:, :, 1], axis=0) / cnt - mean * mean, 0.0)
    scale = gamma.astype(jnp.float32) / jnp.sqrt(var + eps)        # (C_out,)
    shift = beta.astype(jnp.float32) - mean * scale                # (C_out,)
    # TODO(synk): running_mean / running_var buffer updates are not emitted
    # (they do not affect the forward output).

    out = pl.pallas_call(
        _bn_relu_kernel,
        out_shape=jax.ShapeDtypeStruct((N, C_out, HWo), jnp.float32),
        grid_spec=pltpu.PrefetchScalarGridSpec(
            num_scalar_prefetch=0,
            grid=(N,),
            in_specs=[
                pl.BlockSpec((1, C_out, HWo), lambda n: (n, 0, 0)),
                pl.BlockSpec((C_out, 1), lambda n: (0, 0)),
                pl.BlockSpec((C_out, 1), lambda n: (0, 0)),
            ],
            out_specs=pl.BlockSpec((1, C_out, HWo), lambda n: (n, 0, 0)),
        ),
        compiler_params=pltpu.CompilerParams(
            dimension_semantics=("parallel",)),
    )(y, scale.reshape(C_out, 1), shift.reshape(C_out, 1))

    return out.reshape(N, C_out, H_out, W_out)


def deconv2d_batchnorm_relu_ref(x, weight, bias, gamma, beta, *, stride, padding):
    """Pure-JAX reference mirroring the PyTorch module's default forward."""
    eps = 1e-5
    kH, kW = weight.shape[2], weight.shape[3]
    w_t = jnp.transpose(weight.astype(jnp.float32), (1, 0, 2, 3))[:, :, ::-1, ::-1]
    y = lax.conv_general_dilated(
        x.astype(jnp.float32), w_t,
        window_strides=(1, 1),
        padding=((kH - 1 - padding, kH - 1 - padding),
                 (kW - 1 - padding, kW - 1 - padding)),
        lhs_dilation=(stride, stride),
        dimension_numbers=("NCHW", "OIHW", "NCHW"))
    y = y + bias.astype(jnp.float32)[None, :, None, None]
    mean = jnp.mean(y, axis=(0, 2, 3), keepdims=True)
    var = jnp.var(y, axis=(0, 2, 3), keepdims=True)                # biased, as BN uses
    yn = (y - mean) / jnp.sqrt(var + eps)
    out = gamma[None, :, None, None] * yn + beta[None, :, None, None]
    return jnp.maximum(out, 0.0)


if __name__ == "__main__":
    key = jax.random.PRNGKey(0)
    kx, kw, kb, kg, kbt = jax.random.split(key, 5)

    # deconv2DBatchNormRelu(in_channels=4, n_filters=8, k_size=2, stride=2, padding=0)
    N, C_in, H, W = 2, 4, 16, 16
    C_out, k_size, stride, padding = 8, 2, 2, 0

    x = jax.random.normal(kx, (N, C_in, H, W), dtype=jnp.float32)
    weight = 0.1 * jax.random.normal(kw, (C_in, C_out, k_size, k_size), dtype=jnp.float32)
    bias = 0.1 * jax.random.normal(kb, (C_out,), dtype=jnp.float32)
    gamma = 1.0 + 0.2 * jax.random.normal(kg, (C_out,), dtype=jnp.float32)
    beta = 0.1 * jax.random.normal(kbt, (C_out,), dtype=jnp.float32)

    out = deconv2d_batchnorm_relu(x, weight, bias, gamma, beta,
                                  stride=stride, padding=padding)
    jax.block_until_ready(out)

    ref = deconv2d_batchnorm_relu_ref(x, weight, bias, gamma, beta,
                                      stride=stride, padding=padding)
    assert out.shape == ref.shape == (N, C_out, 32, 32), (out.shape, ref.shape)
    assert jnp.allclose(out, ref, atol=1e-4, rtol=1e-4), \
        float(jnp.max(jnp.abs(out - ref)))

    print("KERNEL_OK")
</pallas_src>

<mosaic_0001>
module attributes {stable_mosaic.version = 11 : i64} {
  func.func @_deconv_kernel(%arg0: i32, %arg1: memref<1x33x33x4xf32, #tpu.memory_space<vmem>>, %arg2: memref<4x8x4xf32, #tpu.memory_space<vmem>>, %arg3: memref<8x1xf32, #tpu.memory_space<vmem>>, %arg4: memref<1x8x1024xf32, #tpu.memory_space<vmem>>, %arg5: memref<1x8x2xf32, #tpu.memory_space<vmem>>) attributes {dimension_semantics = [#tpu.dimension_semantics<parallel>], iteration_bounds = array<i64: 2>, scalar_prefetch = 0 : i64, scratch_operands = 0 : i64, tpu.core_type = #tpu.core_type<tc>, window_params = [{transform_indices = @transform_0, window_bounds = array<i64: 1, 33, 33, 4>}, {pipeline_mode = #tpu.pipeline_mode<synchronous>, transform_indices = @transform_1, window_bounds = array<i64: 4, 8, 4>}, {pipeline_mode = #tpu.pipeline_mode<synchronous>, transform_indices = @transform_2, window_bounds = array<i64: 8, 1>}, {transform_indices = @transform_3, window_bounds = array<i64: 1, 8, 1024>}, {transform_indices = @transform_4, window_bounds = array<i64: 1, 8, 2>}]} {
    %c0 = arith.constant 0 : index
    %c0_0 = arith.constant 0 : index
    %c0_1 = arith.constant 0 : index
    %c0_2 = arith.constant 0 : index
    %0 = vector.load %arg1[%c0, %c0_0, %c0_1, %c0_2] : memref<1x33x33x4xf32, #tpu.memory_space<vmem>>, vector<1x33x33x4xf32>
    %1 = vector.shape_cast %0 : vector<1x33x33x4xf32> to vector<33x33x4xf32>
    %cst = arith.constant 0.000000e+00 : f32
    %2 = vector.broadcast %cst : f32 to vector<8x1024xf32>
    %3 = vector.extract_strided_slice %1 {offsets = [0, 0, 0], sizes = [32, 32, 4], strides = [1, 1, 1]} : vector<33x33x4xf32> to vector<32x32x4xf32>
    %4 = vector.shape_cast %3 : vector<32x32x4xf32> to vector<1024x4xf32>
    %c0_3 = arith.constant 0 : index
    %c0_4 = arith.constant 0 : index
    %c0_5 = arith.constant 0 : index
    %5 = vector.load %arg2[%c0_3, %c0_4, %c0_5] : memref<4x8x4xf32, #tpu.memory_space<vmem>>, vector<1x8x4xf32>
    %6 = vector.shape_cast %5 : vector<1x8x4xf32> to vector<8x4xf32>
    %cst_6 = arith.constant dense<0.000000e+00> : vector<8x1024xf32>
    %7 = tpu.matmul %6, %4, %cst_6 {dimension_numbers = #tpu.dot_dimension_numbers<[1], [1], [0], [0], [0, 0, 1, 0], [], []>} : vector<8x4xf32>, vector<1024x4xf32>, vector<8x1024xf32> -> vector<8x1024xf32>
    %8 = arith.addf %2, %7 : vector<8x1024xf32>
    %9 = vector.extract_strided_slice %1 {offsets = [0, 1, 0], sizes = [32, 32, 4], strides = [1, 1, 1]} : vector<33x33x4xf32> to vector<32x32x4xf32>
    %10 = vector.shape_cast %9 : vector<32x32x4xf32> to vector<1024x4xf32>
    %c1 = arith.constant 1 : index
    %c0_7 = arith.constant 0 : index
    %c0_8 = arith.constant 0 : index
    %11 = vector.load %arg2[%c1, %c0_7, %c0_8] : memref<4x8x4xf32, #tpu.memory_space<vmem>>, vector<1x8x4xf32>
    %12 = vector.shape_cast %11 : vector<1x8x4xf32> to vector<8x4xf32>
    %cst_9 = arith.constant dense<0.000000e+00> : vector<8x1024xf32>
    %13 = tpu.matmul %12, %10, %cst_9 {dimension_numbers = #tpu.dot_dimension_numbers<[1], [1], [0], [0], [0, 0, 1, 0], [], []>} : vector<8x4xf32>, vector<1024x4xf32>, vector<8x1024xf32> -> vector<8x1024xf32>
    %14 = arith.addf %8, %13 : vector<8x1024xf32>
    %15 = vector.extract_strided_slice %1 {offsets = [1, 0, 0], sizes = [32, 32, 4], strides = [1, 1, 1]} : vector<33x33x4xf32> to vector<32x32x4xf32>
    %16 = vector.shape_cast %15 : vector<32x32x4xf32> to vector<1024x4xf32>
    %c2 = arith.constant 2 : index
    %c0_10 = arith.constant 0 : index
    %c0_11 = arith.constant 0 : index
    %17 = vector.load %arg2[%c2, %c0_10, %c0_11] : memref<4x8x4xf32, #tpu.memory_space<vmem>>, vector<1x8x4xf32>
    %18 = vector.shape_cast %17 : vector<1x8x4xf32> to vector<8x4xf32>
    %cst_12 = arith.constant dense<0.000000e+00> : vector<8x1024xf32>
    %19 = tpu.matmul %18, %16, %cst_12 {dimension_numbers = #tpu.dot_dimension_numbers<[1], [1], [0], [0], [0, 0, 1, 0], [], []>} : vector<8x4xf32>, vector<1024x4xf32>, vector<8x1024xf32> -> vector<8x1024xf32>
    %20 = arith.addf %14, %19 : vector<8x1024xf32>
    %21 = vector.extract_strided_slice %1 {offsets = [1, 1, 0], sizes = [32, 32, 4], strides = [1, 1, 1]} : vector<33x33x4xf32> to vector<32x32x4xf32>
    %22 = vector.shape_cast %21 : vector<32x32x4xf32> to vector<1024x4xf32>
    %c3 = arith.constant 3 : index
    %c0_13 = arith.constant 0 : index
    %c0_14 = arith.constant 0 : index
    %23 = vector.load %arg2[%c3, %c0_13, %c0_14] : memref<4x8x4xf32, #tpu.memory_space<vmem>>, vector<1x8x4xf32>
    %24 = vector.shape_cast %23 : vector<1x8x4xf32> to vector<8x4xf32>
    %cst_15 = arith.constant dense<0.000000e+00> : vector<8x1024xf32>
    %25 = tpu.matmul %24, %22, %cst_15 {dimension_numbers = #tpu.dot_dimension_numbers<[1], [1], [0], [0], [0, 0, 1, 0], [], []>} : vector<8x4xf32>, vector<1024x4xf32>, vector<8x1024xf32> -> vector<8x1024xf32>
    %26 = arith.addf %20, %25 : vector<8x1024xf32>
    %c0_16 = arith.constant 0 : index
    %c0_17 = arith.constant 0 : index
    %27 = vector.load %arg3[%c0_16, %c0_17] : memref<8x1xf32, #tpu.memory_space<vmem>>, vector<8x1xf32>
    %28 = vector.broadcast %27 : vector<8x1xf32> to vector<8x1024xf32>
    %29 = arith.addf %26, %28 : vector<8x1024xf32>
    %c0_18 = arith.constant 0 : index
    %c0_19 = arith.constant 0 : index
    %c0_20 = arith.constant 0 : index
    %30 = vector.load %arg4[%c0_18, %c0_19, %c0_20] : memref<1x8x1024xf32, #tpu.memory_space<vmem>>, vector<1x8x1024xf32>
    %31 = vector.shape_cast %30 : vector<1x8x1024xf32> to vector<8x1024xf32>
    %32 = vector.shape_cast %29 : vector<8x1024xf32> to vector<1x8x1024xf32>
    tpu.vector_store %arg4[%c0_18, %c0_19, %c0_20], %32 {strides = array<i32>} : memref<1x8x1024xf32, #tpu.memory_space<vmem>>, vector<1x8x1024xf32>,
    %cst_21 = arith.constant dense<0.000000e+00> : vector<8xf32>
    %33 = vector.multi_reduction <add>, %29, %cst_21 [1] : vector<8x1024xf32> to vector<8xf32>
    %34 = vector.shape_cast %33 : vector<8xf32> to vector<8x1xf32>
    %35 = arith.mulf %29, %29 : vector<8x1024xf32>
    %cst_22 = arith.constant dense<0.000000e+00> : vector<8xf32>
    %36 = vector.multi_reduction <add>, %35, %cst_22 [1] : vector<8x1024xf32> to vector<8xf32>
    %37 = vector.shape_cast %36 : vector<8xf32> to vector<8x1xf32>
    %38 = tpu.concatenate %34, %37 in 1 : vector<8x1xf32>, vector<8x1xf32> -> vector<8x2xf32>
    %c0_23 = arith.constant 0 : index
    %c0_24 = arith.constant 0 : index
    %c0_25 = arith.constant 0 : index
    %39 = vector.load %arg5[%c0_23, %c0_24, %c0_25] : memref<1x8x2xf32, #tpu.memory_space<vmem>>, vector<1x8x2xf32>
    %40 = vector.shape_cast %39 : vector<1x8x2xf32> to vector<8x2xf32>
    %41 = vector.shape_cast %38 : vector<8x2xf32> to vector<1x8x2xf32>
    tpu.vector_store %arg5[%c0_23, %c0_24, %c0_25], %41 {strides = array<i32>} : memref<1x8x2xf32, #tpu.memory_space<vmem>>, vector<1x8x2xf32>,
    return
  }
  func.func @transform_0(%arg0: i32) -> (i32, i32, i32, i32) {
    %c0_i32 = arith.constant 0 : i32
    %c0_i32_0 = arith.constant 0 : i32
    %c0_i32_1 = arith.constant 0 : i32
    %c0_i32_2 = arith.constant 0 : i32
    return %arg0, %c0_i32, %c0_i32_0, %c0_i32_1 : i32, i32, i32, i32
  }
  func.func @transform_1(%arg0: i32) -> (i32, i32, i32) {
    %c0_i32 = arith.constant 0 : i32
    %c0_i32_0 = arith.constant 0 : i32
    %c0_i32_1 = arith.constant 0 : i32
    %c0_i32_2 = arith.constant 0 : i32
    return %c0_i32, %c0_i32_0, %c0_i32_1 : i32, i32, i32
  }
  func.func @transform_2(%arg0: i32) -> (i32, i32) {
    %c0_i32 = arith.constant 0 : i32
    %c0_i32_0 = arith.constant 0 : i32
    %c0_i32_1 = arith.constant 0 : i32
    return %c0_i32, %c0_i32_0 : i32, i32
  }
  func.func @transform_3(%arg0: i32) -> (i32, i32, i32) {
    %c0_i32 = arith.constant 0 : i32
    %c0_i32_0 = arith.constant 0 : i32
    %c0_i32_1 = arith.constant 0 : i32
    return %arg0, %c0_i32, %c0_i32_0 : i32, i32, i32
  }
  func.func @transform_4(%arg0: i32) -> (i32, i32, i32) {
    %c0_i32 = arith.constant 0 : i32
    %c0_i32_0 = arith.constant 0 : i32
    %c0_i32_1 = arith.constant 0 : i32
    return %arg0, %c0_i32, %c0_i32_0 : i32, i32, i32
  }
}

module attributes {stable_mosaic.version = 11 : i64} {
  func.func @_bn_relu_kernel(%arg0: i32, %arg1: memref<1x8x1024xf32, #tpu.memory_space<vmem>>, %arg2: memref<8x1xf32, #tpu.memory_space<vmem>>, %arg3: memref<8x1xf32, #tpu.memory_space<vmem>>, %arg4: memref<1x8x1024xf32, #tpu.memory_space<vmem>>) attributes {dimension_semantics = [#tpu.dimension_semantics<parallel>], iteration_bounds = array<i64: 2>, scalar_prefetch = 0 : i64, scratch_operands = 0 : i64, tpu.core_type = #tpu.core_type<tc>, window_params = [{transform_indices = @transform_0, window_bounds = array<i64: 1, 8, 1024>}, {pipeline_mode = #tpu.pipeline_mode<synchronous>, transform_indices = @transform_1, window_bounds = array<i64: 8, 1>}, {pipeline_mode = #tpu.pipeline_mode<synchronous>, transform_indices = @transform_2, window_bounds = array<i64: 8, 1>}, {transform_indices = @transform_3, window_bounds = array<i64: 1, 8, 1024>}]} {
    %c0 = arith.constant 0 : index
    %c0_0 = arith.constant 0 : index
    %c0_1 = arith.constant 0 : index
    %0 = vector.load %arg1[%c0, %c0_0, %c0_1] : memref<1x8x1024xf32, #tpu.memory_space<vmem>>, vector<1x8x1024xf32>
    %1 = vector.shape_cast %0 : vector<1x8x1024xf32> to vector<8x1024xf32>
    %c0_2 = arith.constant 0 : index
    %c0_3 = arith.constant 0 : index
    %2 = vector.load %arg2[%c0_2, %c0_3] : memref<8x1xf32, #tpu.memory_space<vmem>>, vector<8x1xf32>
    %3 = vector.broadcast %2 : vector<8x1xf32> to vector<8x1024xf32>
    %4 = arith.mulf %1, %3 : vector<8x1024xf32>
    %c0_4 = arith.constant 0 : index
    %c0_5 = arith.constant 0 : index
    %5 = vector.load %arg3[%c0_4, %c0_5] : memref<8x1xf32, #tpu.memory_space<vmem>>, vector<8x1xf32>
    %6 = vector.broadcast %5 : vector<8x1xf32> to vector<8x1024xf32>
    %7 = arith.addf %4, %6 : vector<8x1024xf32>
    %cst = arith.constant 0.000000e+00 : f32
    %8 = vector.broadcast %cst : f32 to vector<8x1024xf32>
    %9 = arith.maximumf %7, %8 : vector<8x1024xf32>
    %c0_6 = arith.constant 0 : index
    %c0_7 = arith.constant 0 : index
    %c0_8 = arith.constant 0 : index
    %10 = vector.load %arg4[%c0_6, %c0_7, %c0_8] : memref<1x8x1024xf32, #tpu.memory_space<vmem>>, vector<1x8x1024xf32>
    %11 = vector.shape_cast %10 : vector<1x8x1024xf32> to vector<8x1024xf32>
    %12 = vector.shape_cast %9 : vector<8x1024xf32> to vector<1x8x1024xf32>
    tpu.vector_store %arg4[%c0_6, %c0_7, %c0_8], %12 {strides = array<i32>} : memref<1x8x1024xf32, #tpu.memory_space<vmem>>, vector<1x8x1024xf32>,
    return
  }
  func.func @transform_0(%arg0: i32) -> (i32, i32, i32) {
    %c0_i32 = arith.constant 0 : i32
    %c0_i32_0 = arith.constant 0 : i32
    %c0_i32_1 = arith.constant 0 : i32
    return %arg0, %c0_i32, %c0_i32_0 : i32, i32, i32
  }
  func.func @transform_1(%arg0: i32) -> (i32, i32) {
    %c0_i32 = arith.constant 0 : i32
    %c0_i32_0 = arith.constant 0 : i32
    %c0_i32_1 = arith.constant 0 : i32
    return %c0_i32, %c0_i32_0 : i32, i32
  }
  func.func @transform_2(%arg0: i32) -> (i32, i32) {
    %c0_i32 = arith.constant 0 : i32
    %c0_i32_0 = arith.constant 0 : i32
    %c0_i32_1 = arith.constant 0 : i32
    return %c0_i32, %c0_i32_0 : i32, i32
  }
  func.func @transform_3(%arg0: i32) -> (i32, i32, i32) {
    %c0_i32 = arith.constant 0 : i32
    %c0_i32_0 = arith.constant 0 : i32
    %c0_i32_1 = arith.constant 0 : i32
    return %arg0, %c0_i32, %c0_i32_0 : i32, i32, i32
  }
}

</mosaic_0001>

<bundles_post_ra>
// kernel: deconv2d_batchnorm_relu.3
= control target key start
LH: loop header
LB: loop body
LE: loop exit
PB: predicated region body
PF: predicated region fallthrough
CT: control target
= control target key end

     0   :  { %s330_s12 = smov 0   ;;  %s353_s0 = inlined_call_operand.vmem [shape: f32[2,8,1024], index: 0, kind: input, shape index: {}]   ;;  %s354_s1 = inlined_call_operand.vmem [shape: f32[8,1], index: 1, kind: input, shape index: {}]   ;;  %s355_s2 = inlined_call_operand.vmem [shape: f32[8,1], index: 2, kind: input, shape index: {}]   ;;  %s356_s3 = inlined_call_operand.vmem [shape: f32[2,8,1024], index: 3, kind: output, shape index: {}]  }
   0x1 LB: > { %s278_s13 = sadd.s32 4294967295, %s307_s12   ;;  %p282_p0 = scmp.ge.s32.totalorder %s307_s12, 1  ;;  %s307_s12 = sphi %s330_s12, %s13_s12  }
   0x2   : > { %p137_p1 = scmp.lt.s32.totalorder %s307_s12, 3 }
   0x4   : > { %p138_p2 = pnand %p282_p0, %p137_p1 }
   0x5   : > { %v179_v0 = vld [vmem:[%s354_s1] sm:$0xff] (!%p138_p2)  ;;  %v309_v1 = vmov (!%p138_p2), 0   ;;  %p161_p3 = scmp.lt.s32.totalorder (!%p138_p2), %s278_s13, 1 }
   0x6   : > { %141 = sbr.rel (%p138_p2) target bundleno = 147 (0x93), region = 32  ;;  %300 = vset.pattern.permute.xlu0 (!%p138_p2), %v309_v1  ;;  %v193_v2 = vld [vmem:[%s355_s2] sm:$0xff] (!%p138_p2) }
   0x7   : > { %182 = vperm.xlu0 (!%p138_p2), %300, %v179_v0  }
   0xb   : > { %196 = vperm.xlu0 (!%p138_p2), %300, %v193_v2  }
   0xd   : > { %s358_s13 = smov (!%p161_p3, %s278_s13), 1 }
   0xe   : > { %s289_s18 = sshll.u32 %s358_s13, 6 }
   0xf   : > { %s165_s21 = scalar_lea.vmem %s353_s0, %s289_s18  ;;  %s170_s24 = scalar_lea.vmem %s356_s3, %s289_s18 }
  0x10   : > { %v171_v3 = vld [vmem:[%s165_s21] sm:$0xff]  ;;  %v172_v4 = vld [vmem:[%s165_s21 + $0x8] sm:$0xff]  ;;  %v173_v6 = vld [vmem:[%s165_s21 + $0x10] sm:$0xff] }
  0x11   : > { %v174_v7 = vld [vmem:[%s165_s21 + $0x18] sm:$0xff]  ;;  %v175_v8 = vld [vmem:[%s165_s21 + $0x20] sm:$0xff]  ;;  %v176_v9 = vld [vmem:[%s165_s21 + $0x28] sm:$0xff] }
  0x12   : > { %v177_v10 = vld [vmem:[%s165_s21 + $0x30] sm:$0xff]  ;;  %v178_v11 = vld [vmem:[%s165_s21 + $0x38] sm:$0xff] }
  0x86   : > { %v183_v5 = vpop.permute.xlu0 %182 }
  0x87   : > { %v185_v12 = vmul.f32 %v183_v5, %v171_v3  ;;  %v186_v13 = vmul.f32 %v183_v5, %v172_v4  ;;  %v187_v14 = vmul.f32 %v183_v5, %v173_v6  ;;  %v188_v15 = vmul.f32 %v183_v5, %v174_v7 }
  0x88   : > { %v189_v17 = vmul.f32 %v183_v5, %v175_v8  ;;  %v190_v18 = vmul.f32 %v183_v5, %v176_v9  ;;  %v191_v19 = vmul.f32 %v183_v5, %v177_v10  ;;  %v192_v20 = vmul.f32 %v183_v5, %v178_v11 }
  0x8a   : > { %v197_v16 = vpop.permute.xlu0 %196 }
  0x8b   : > { %v199_v21 = vadd.f32 %v197_v16, %v185_v12  ;;  %v200_v22 = vadd.f32 %v197_v16, %v186_v13  ;;  %v201_v23 = vadd.f32 %v197_v16, %v187_v14  ;;  %v202_v24 = vadd.f32 %v197_v16, %v188_v15 }
  0x8c   : > { %v203_v25 = vadd.f32 %v197_v16, %v189_v17  ;;  %v204_v26 = vadd.f32 %v197_v16, %v190_v18  ;;  %v205_v27 = vadd.f32 %v197_v16, %v191_v19  ;;  %v206_v28 = vadd.f32 %v197_v16, %v192_v20 }
  0x8d   : > { %v207_v29 = vmax.f32 %v199_v21, 0.0  ;;  %v208_v30 = vmax.f32 %v200_v22, 0.0  ;;  %v209_v31 = vmax.f32 %v201_v23, 0.0  ;;  %v210_v32 = vmax.f32 %v202_v24, 0.0 }
  0x8e   : > { %v211_v33 = vmax.f32 %v203_v25, 0.0  ;;  %v212_v34 = vmax.f32 %v204_v26, 0.0  ;;  %v213_v35 = vmax.f32 %v205_v27, 0.0  ;;  %v214_v36 = vmax.f32 %v206_v28, 0.0 }
  0x8f   : > { %215 = vst [vmem:[%s170_s24] sm:$0xff] %v207_v29  ;;  %216 = vst [vmem:[%s170_s24 + $0x8] sm:$0xff] %v208_v30 }
  0x90   : > { %217 = vst [vmem:[%s170_s24 + $0x10] sm:$0xff] %v209_v31  ;;  %218 = vst [vmem:[%s170_s24 + $0x18] sm:$0xff] %v210_v32 }
  0x91   : > { %219 = vst [vmem:[%s170_s24 + $0x20] sm:$0xff] %v211_v33  ;;  %220 = vst [vmem:[%s170_s24 + $0x28] sm:$0xff] %v212_v34 }
  0x92   : > { %221 = vst [vmem:[%s170_s24 + $0x30] sm:$0xff] %v213_v35  ;;  %222 = vst [vmem:[%s170_s24 + $0x38] sm:$0xff] %v214_v36 }
  0x93 PF: > { %s13_s12 = sadd.s32 1, %s307_s12  }
  0x94   : > { %p10_p4 = scmp.ge.s32.totalorder %s13_s12, 4  }
  0x96   :  { %12 = sbr.rel (!%p10_p4) target bundleno = 1 (0x1), region = 62 }

// kernel: deconv2d_batchnorm_relu.2
= control target key start
LH: loop header
LB: loop body
LE: loop exit
PB: predicated region body
PF: predicated region fallthrough
CT: control target
= control target key end

     0   :  { %s4631_s15 = smov 0   ;;  %s6481_s0 = inlined_call_operand.vmem [shape: f32[2,33,33,4], index: 0, kind: input, shape index: {}]   ;;  %s6482_s1 = inlined_call_operand.vmem [shape: f32[4,8,4], index: 1, kind: input, shape index: {}]   ;;  %s6483_s2 = inlined_call_operand.vmem [shape: f32[8,1], index: 2, kind: input, shape index: {}]   ;;  %s6484_s3 = inlined_call_operand.vmem [shape: f32[2,8,1024], index: 3, kind: output, shape index: {0}]   ;;  %s6485_s4 = inlined_call_operand.vmem [shape: f32[2,8,2], index: 4, kind: output, shape index: {1}]  }
   0x1 LB: > { %s2675_s16 = sadd.s32 4294967295, %s4603_s15   ;;  %p2679_p0 = scmp.ge.s32.totalorder %s4603_s15, 1  ;;  %s4603_s15 = sphi %s4631_s15, %s15_s15  }
   0x2   : > { %p165_p1 = scmp.lt.s32.totalorder %s4603_s15, 3 }
   0x4   : > { %p166_p2 = pnand %p2679_p0, %p165_p1 }
   0x6   : > { %169 = sbr.rel (%p166_p2) target bundleno = 907 (0x38b), region = 32 }
   0xd   : > { %p195_p3 = scmp.lt.s32.totalorder %s2675_s16, 1  ;;  %vm826_vm0 = vcmask 31744   ;;  %v4642_v0 = vld [vmem:[%s6482_s1 + $0x8] sm:$0xff]  ;;  %vm535_vm1 = vcmask 1046528   ;;  %vm2585_vm3 = vcmask 7168   ;;  %vm2587_vm4 = vcmask 15360  }
   0xe   : > { %3250 = vmatprep.mubr.msk.f32.mxu0 %vm826_vm0, %v4642_v0  ;;  %3284 = vmatprep.mubr.msk.f32.mxu1 %vm826_vm0, %v4642_v0  ;;  %vm4675_vm2 = vmpackc.low %vm826_vm0, %vm826_vm0 }
   0xf   : > { %s6831_s16 = smov (!%p195_p3, %s2675_s16), 1 }
  0x10   : > { %s4554_s19 = smul.u32 1320, %s6831_s16  ;;  %s3217_s7 = sshll.u32 %s6831_s16, 6 }
  0x11   : > { %s6464_s10 = scalar_lea.vmem %s6484_s3, %s3217_s7  ;;  %s2683_s11 = sshll.u32 %s6831_s16, 3 }
  0x12   : > { %s4654_s22 = scalar_lea.vmem %s6481_s0, %s4554_s19  ;;  %s208_s14 = scalar_lea.vmem %s6485_s4, %s2683_s11 }
  0x13   : > { %v229_v1 = vld [vmem:[%s4654_s22 + $0xa0] sm:$0xff]  ;;  %v230_v2 = vld [vmem:[%s4654_s22 + $0xa8] sm:$0xff]  ;;  %v231_v3 = vld [vmem:[%s4654_s22 + $0xb0] sm:$0xff] }
  0x14   : > { %v572_v4 = vrot.slane %v229_v1, 1  ;;  %v573_v5 = vrot.slane %v230_v2, 1  ;;  %v575_v6 = vrot.slane %v231_v3, 1  ;;  %v269_v7 = vld [vmem:[%s4654_s22 + $0x1e0] sm:$0xff]  ;;  %v270_v8 = vld [vmem:[%s4654_s22 + $0x1e8] sm:$0xff]  ;;  %v271_v9 = vld [vmem:[%s4654_s22 + $0x1f0] sm:$0xff] }
  0x15   : > { %v644_v10 = vrot.slane %v269_v7, 1  ;;  %v645_v11 = vrot.slane %v270_v8, 1  ;;  %v647_v12 = vrot.slane %v271_v9, 1  ;;  %v4663_v13 = vld [vmem:[%s4654_s22] sm:$0xff]  ;;  %v4666_v14 = vld [vmem:[%s4654_s22 + $0x8] sm:$0xff]  ;;  %v4669_v15 = vld [vmem:[%s4654_s22 + $0x10] sm:$0xff] }
  0x16   : > { %6598 = vst [vmem:[#allocation2_spill] sm:$0xff] %v4663_v13  ;;  %6599 = vst [vmem:[#allocation3_spill] sm:$0xff] %v4666_v14  ;;  %v574_v16 = vsel %vm535_vm1, %v572_v4, %v573_v5  ;;  %v576_v17 = vsel %vm535_vm1, %v573_v5, %v575_v6  ;;  %v536_v19 = vrot.slane %v4663_v13, 1  ;;  %v537_v20 = vrot.slane %v4666_v14, 1  ;;  %v249_v21 = vld [vmem:[%s4654_s22 + $0x140] sm:$0xff]  ;;  %v250_v22 = vld [vmem:[%s4654_s22 + $0x148] sm:$0xff] }
  0x17   : > { %6600 = vst [vmem:[#allocation4_spill] sm:$0xff] %v4669_v15  ;;  %v4683_v23 = vpack.c.bf16 %v576_v17, %v574_v16  ;;  %v646_v24 = vsel %vm535_vm1, %v644_v10, %v645_v11  ;;  %v648_v25 = vsel %vm535_vm1, %v645_v11, %v647_v12  ;;  %v4688_v26 = vld [vmem:[%s4654_s22 + $0x18] sm:$0xff]  ;;  %v539_v27 = vrot.slane %v4669_v15, 1  ;;  %v251_v28 = vld [vmem:[%s4654_s22 + $0x150] sm:$0xff]  ;;  %v233_v34 = vld [vmem:[%s4654_s22 + $0xc0] sm:$0x1] }
  0x18   : > { %6604 = vst [vmem:[#allocation6_spill] sm:$0xff] %v4688_v26  ;;  %v232_v29 = vld [vmem:[%s4654_s22 + $0xb8] sm:$0xff]  ;;  %v4693_v30 = vpack.c.bf16 %v648_v25, %v646_v24  ;;  %v538_v31 = vsel %vm535_vm1, %v536_v19, %v537_v20  ;;  %v608_v38 = vrot.slane %v249_v21, 1  ;;  %v609_v39 = vrot.slane %v250_v22, 1  ;;  %v273_v41 = vld [vmem:[%s4654_s22 + $0x200] sm:$0x1] }
  0x19   : > { %6603 = vst [vmem:[#allocation5_spill] sm:$0xff] %v4683_v23  ;;  %v272_v35 = vld [vmem:[%s4654_s22 + $0x1f8] sm:$0xff]  ;;  %3764 = vmatprep.subr.msk.bf16.mxu0 %vm4675_vm2, %v4683_v23  ;;  %v540_v36 = vsel %vm535_vm1, %v537_v20, %v539_v27  ;;  %v611_v40 = vrot.slane %v251_v28, 1  ;;  %v4711_v43 = vpack.c.bf16 %v250_v22, %v249_v21  ;;  %v577_v45 = vrot.slane %v232_v29, 1  ;;  %v213_v46 = vld [vmem:[%s4654_s22 + $0x20] sm:$0x1] }
  0x1a   : > { %6605 = vst [vmem:[#allocation7_spill] sm:$0xff] %v4693_v30  ;;  %v252_v37 = vld [vmem:[%s4654_s22 + $0x158] sm:$0xff]  ;;  %3812 = vmatprep.subr.msk.bf16.mxu1 %vm4675_vm2, %v4693_v30  ;;  %v3765_v42 = vpack.c.bf16 %v540_v36, %v538_v31  ;;  %v610_v47 = vsel %vm535_vm1, %v608_v38, %v609_v39  ;;  %v579_v49 = vrot.slane %v233_v34, 1  ;;  %v649_v50 = vrot.slane %v272_v35, 1  ;;  %v253_v51 = vld [vmem:[%s4654_s22 + $0x160] sm:$0x1] }
  0x1b   : > { %6606 = vst [vmem:[#allocation8_spill] sm:$0xff] %v4711_v43  ;;  %v4713_v44 = vpack.c.bf16 %v252_v37, %v251_v28  ;;  %v612_v48 = vsel %vm535_vm1, %v609_v39, %v611_v40  ;;  %v578_v53 = vsel %vm535_vm1, %v575_v6, %v577_v45  ;;  %v651_v54 = vrot.slane %v273_v41, 1  ;;  %v234_v56 = vld [vmem:[%s4654_s22 + $0xc8] sm:$0xff]  ;;  %v235_v61 = vld [vmem:[%s4654_s22 + $0xd0] sm:$0xff]  ;;  %v236_v62 = vld [vmem:[%s4654_s22 + $0xd8] sm:$0xff] }
  0x1c   : > { %3767 = vmatpush3.bf16.xpose.msk.msra.mxu0 %vm4675_vm2, %v3765_v42  ;;  %v4721_v52 = vpack.c.bf16 %v612_v48, %v610_v47  ;;  %v541_v55 = vrot.slane %v4688_v26, 1  ;;  %v580_v57 = vsel %vm535_vm1, %v577_v45, %v579_v49  ;;  %v650_v58 = vsel %vm535_vm1, %v647_v12, %v649_v50  ;;  %v274_v4 = vld [vmem:[%s4654_s22 + $0x208] sm:$0xff]  ;;  %v275_v5 = vld [vmem:[%s4654_s22 + $0x210] sm:$0xff]  ;;  %v276_v6 = vld [vmem:[%s4654_s22 + $0x218] sm:$0xff] }
  0x1d   : > { %6607 = vst [vmem:[#allocation9_spill] sm:$0xff] %v4713_v44  ;;  %v543_v59 = vrot.slane %v213_v46, 1  ;;  %v613_v60 = vrot.slane %v252_v37, 1  ;;  %v4733_v63 = vpack.c.bf16 %v580_v57, %v578_v53  ;;  %v652_v1 = vsel %vm535_vm1, %v649_v50, %v651_v54  ;;  %v214_v11 = vld [vmem:[%s4654_s22 + $0x28] sm:$0xff]  ;;  %v215_v12 = vld [vmem:[%s4654_s22 + $0x30] sm:$0xff]  ;;  %v4751_v21 = vld [vmem:[%s4654_s22 + $0x38] sm:$0xff] }
  0x1e   : > { %6608 = vst [vmem:[#allocation10_spill] sm:$0xff] %v4721_v52  ;;  %3815 = vmatpush3.bf16.xpose.msk.msra.mxu1 %vm4675_vm2, %v4721_v52  ;;  %v542_v2 = vsel %vm535_vm1, %v539_v27, %v541_v55  ;;  %v615_v3 = vrot.slane %v253_v51, 1  ;;  %v4740_v7 = vpack.c.bf16 %v652_v1, %v650_v58  ;;  %v581_v10 = vrot.slane %v234_v56, 1  ;;  %v254_v28 = vld [vmem:[%s4654_s22 + $0x168] sm:$0xff]  ;;  %v255_v29 = vld [vmem:[%s4654_s22 + $0x170] sm:$0xff]  ;;  %v4763_v37 = vld [vmem:[%s4654_s22 + $0x178] sm:$0xff] }
  0x1f   : > { %6609 = vst [vmem:[#allocation11_spill] sm:$0xff] %v4733_v63  ;;  %v544_v8 = vsel %vm535_vm1, %v541_v55, %v543_v59  ;;  %v614_v9 = vsel %vm535_vm1, %v611_v40, %v613_v60  ;;  %3770 = vmatprep.subr.msk.bf16.mxu0 %vm4675_vm2, %v4733_v63  ;;  %v582_v19 = vrot.slane %v235_v61, 1  ;;  %v584_v20 = vrot.slane %v236_v62, 1  ;;  %v237_v38 = vld [vmem:[%s4654_s22 + $0xe0] sm:$0xff]  ;;  %v238_v39 = vld [vmem:[%s4654_s22 + $0xe8] sm:$0x1] }
  0x20   : > { %6610 = vst [vmem:[#allocation12_spill] sm:$0xff] %v4740_v7  ;;  %v3771_v16 = vpack.c.bf16 %v544_v8, %v542_v2  ;;  %v616_v17 = vsel %vm535_vm1, %v613_v60, %v615_v3  ;;  %3818 = vmatprep.subr.msk.bf16.mxu1 %vm4675_vm2, %v4740_v7  ;;  %v653_v24 = vrot.slane %v274_v4, 1  ;;  %v654_v25 = vrot.slane %v275_v5, 1  ;;  %v277_v46 = vld [vmem:[%s4654_s22 + $0x220] sm:$0xff]  ;;  %v278_v47 = vld [vmem:[%s4654_s22 + $0x228] sm:$0x1] }
  0x21   : > { %v4756_v22 = vpack.c.bf16 %v616_v17, %v614_v9  ;;  %v656_v27 = vrot.slane %v276_v6, 1  ;;  %v583_v31 = vsel %vm535_vm1, %v581_v10, %v582_v19  ;;  %v585_v34 = vsel %vm535_vm1, %v582_v19, %v584_v20  ;;  %v217_v57 = vld [vmem:[%s4654_s22 + $0x40] sm:$0xff]  ;;  %v218_v60 = vld [vmem:[%s4654_s22 + $0x48] sm:$0x1]  ;;  %v239_v3 = vld [vmem:[%s4654_s22 + $0xf0] sm:$0xff] }
  0x22   : > { %v545_v35 = vrot.slane %v214_v11, 1  ;;  %v546_v36 = vrot.slane %v215_v12, 1  ;;  %v4767_v40 = vpack.c.bf16 %v585_v34, %v583_v31  ;;  %v655_v41 = vsel %vm535_vm1, %v653_v24, %v654_v25  ;;  %v240_v4 = vld [vmem:[%s4654_s22 + $0xf8] sm:$0xff]  ;;  %v4799_v5 = vld [vmem:[%s4654_s22 + $0x100] sm:$0xff]  ;;  %v258_v12 = vld [vmem:[%s4654_s22 + $0x188] sm:$0x1] }
  0x23   : > { %6611 = vst [vmem:[#allocation13_spill] sm:$0xff] %v4756_v22  ;;  %v657_v42 = vsel %vm535_vm1, %v654_v25, %v656_v27  ;;  %v548_v45 = vrot.slane %v4751_v21, 1  ;;  %v617_v50 = vrot.slane %v254_v28, 1  ;;  %v618_v51 = vrot.slane %v255_v29, 1  ;;  %v257_v11 = vld [vmem:[%s4654_s22 + $0x180] sm:$0xff]  ;;  %v279_v19 = vld [vmem:[%s4654_s22 + $0x230] sm:$0xff] }
  0x24   : > { %6612 = vst [vmem:[#allocation14_spill] sm:$0xff] %v4767_v40  ;;  %3773 = vmatpush3.bf16.xpose.msk.msra.mxu0 %vm4675_vm2, %v3771_v16  ;;  %v4776_v48 = vpack.c.bf16 %v657_v42, %v655_v41  ;;  %v547_v49 = vsel %vm535_vm1, %v545_v35, %v546_v36  ;;  %v620_v54 = vrot.slane %v4763_v37, 1  ;;  %v586_v55 = vrot.slane %v237_v38, 1  ;;  %v4815_v29 = vld [vmem:[%s4654_s22 + $0x240] sm:$0xff]  ;;  %v4988_v7 = vld [vmem:[%s4654_s22 + $0x1c8] sm:$0xff]  ;;  %v4991_v63 = vld [vmem:[%s4654_s22 + $0x270] sm:$0xff] }
  0x25   : > { %3776 = vmatprep.subr.msk.bf16.mxu0 %vm4675_vm2, %v4767_v40  ;;  %v549_v53 = vsel %vm535_vm1, %v546_v36, %v548_v45  ;;  %v588_v56 = vrot.slane %v238_v39, 1  ;;  %v658_v58 = vrot.slane %v277_v46, 1  ;;  %v660_v59 = vrot.slane %v278_v47, 1  ;;  %v4831_v46 = vld [vmem:[%s4654_s22 + $0x50] sm:$0xff]  ;;  %v4840_v47 = vld [vmem:[%s4654_s22 + $0x60] sm:$0xff]  ;;  %v5179_v44 = vld [vmem:[%s4654_s22 + $0x498] sm:$0xff] }
  0x26   : > { %6613 = vst [vmem:[#allocation15_spill] sm:$0xff] %v4776_v48  ;;  %3821 = vmatpush3.bf16.xpose.msk.msra.mxu1 %vm4675_vm2, %v4756_v22  ;;  %v619_v61 = vsel %vm535_vm1, %v617_v50, %v618_v51  ;;  %v621_v62 = vsel %vm535_vm1, %v618_v51, %v620_v54  ;;  %v587_v1 = vsel %vm535_vm1, %v584_v20, %v586_v55  ;;  %v550_v10 = vrot.slane %v217_v57, 1  ;;  %v280_v20 = vld [vmem:[%s4654_s22 + $0x238] sm:$0xff]  ;;  %v243_v50 = vld [vmem:[%s4654_s22 + $0x110] sm:$0x1]  ;;  %v5197_v15 = vld [vmem:[%s4654_s22 + $0x2a8] sm:$0xff] }
  0x27   : > { %3824 = vmatprep.subr.msk.bf16.mxu1 %vm4675_vm2, %v4776_v48  ;;  %v589_v2 = vsel %vm535_vm1, %v586_v55, %v588_v56  ;;  %v4801_v6 = vpack.c.bf16 %v549_v53, %v547_v49  ;;  %v659_v8 = vsel %vm535_vm1, %v656_v27, %v658_v58  ;;  %v661_v9 = vsel %vm535_vm1, %v658_v58, %v660_v59  ;;  %v4843_v49 = vld [vmem:[%s4654_s22 + $0x108] sm:$0xff]  ;;  %v4854_v56 = vld [vmem:[%s4654_s22 + $0x190] sm:$0xff]  ;;  %v288_v30 = vld [vmem:[%s4654_s22 + $0x278] sm:$0x1] }
  0x28   : > { %v4807_v16 = vpack.c.bf16 %v589_v2, %v587_v1  ;;  %v552_v17 = vrot.slane %v218_v60, 1  ;;  %v4811_v21 = vpack.c.bf16 %v621_v62, %v619_v61  ;;  %v590_v24 = vrot.slane %v239_v3, 1  ;;  %6618 = vst [vmem:[#allocation20_spill] sm:$0xff] %v4831_v46  ;;  %6620 = vst [vmem:[#allocation22_spill] sm:$0xff] %v4843_v49  ;;  %v4862_v61 = vld [vmem:[%s4654_s22 + $0x198] sm:$0xff]  ;;  %v4865_v62 = vld [vmem:[%s4654_s22 + $0x1a0] sm:$0xff] }
  0x29   : > { %6614 = vst [vmem:[#allocation16_spill] sm:$0xff] %v4801_v6  ;;  %v591_v25 = vrot.slane %v240_v4, 1  ;;  %v593_v28 = vrot.slane %v4799_v5, 1  ;;  %v4817_v27 = vpack.c.bf16 %v661_v9, %v659_v8  ;;  %v622_v31 = vrot.slane %v257_v11, 1  ;;  %6622 = vst [vmem:[#allocation24_spill] sm:$0xff] %v4854_v56  ;;  %v4868_v1 = vld [vmem:[%s4654_s22 + $0x248] sm:$0xff] }
  0x2a   : > { %6615 = vst [vmem:[#allocation17_spill] sm:$0xff] %v4807_v16  ;;  %6616 = vst [vmem:[#allocation18_spill] sm:$0xff] %v4811_v21  ;;  %v624_v34 = vrot.slane %v258_v12, 1  ;;  %v551_v35 = vsel %vm535_vm1, %v548_v45, %v550_v10  ;;  %v553_v36 = vsel %vm535_vm1, %v550_v10, %v552_v17  ;;  %v662_v37 = vrot.slane %v279_v19, 1  ;;  %v4834_v45 = vld [vmem:[%s4654_s22 + $0x58] sm:$0xff]  ;;  %v5222_v26 = vld [vmem:[%s4654_s22 + $0x3f0] sm:$0xff] }
  0x2b   : > { %6617 = vst [vmem:[#allocation19_spill] sm:$0xff] %v4817_v27  ;;  %v663_v38 = vrot.slane %v280_v20, 1  ;;  %v592_v39 = vsel %vm535_vm1, %v590_v24, %v591_v25  ;;  %v594_v41 = vsel %vm535_vm1, %v591_v25, %v593_v28  ;;  %v665_v42 = vrot.slane %v4815_v29, 1  ;;  %6619 = vst [vmem:[#allocation21_spill] sm:$0xff] %v4834_v45  ;;  %v283_v5 = vld [vmem:[%s4654_s22 + $0x250] sm:$0x1] }
  0x2c   : > { %3779 = vmatpush3.bf16.xpose.msk.msra.mxu0 %vm4675_vm2, %v4801_v6  ;;  %v4849_v51 = vpack.c.bf16 %v553_v36, %v551_v35  ;;  %v623_v53 = vsel %vm535_vm1, %v620_v54, %v622_v31  ;;  %v625_v55 = vsel %vm535_vm1, %v622_v31, %v624_v34  ;;  %v4856_v57 = vpack.c.bf16 %v594_v41, %v592_v39  ;;  %v4893_v31 = vld [vmem:[%s4654_s22 + $0x68] sm:$0xff]  ;;  %v223_v34 = vld [vmem:[%s4654_s22 + $0x70] sm:$0x1]  ;;  %v4912_v39 = vld [vmem:[%s4654_s22 + $0x120] sm:$0xff] }
  0x2d   : > { %3782 = vmatprep.subr.msk.bf16.mxu0 %vm4675_vm2, %v4807_v16  ;;  %v664_v58 = vsel %vm535_vm1, %v662_v37, %v663_v38  ;;  %v666_v59 = vsel %vm535_vm1, %v663_v38, %v665_v42  ;;  %v554_v60 = vrot.slane %v4831_v46, 1  ;;  %6624 = vst [vmem:[#allocation26_spill] sm:$0xff] %v4862_v61  ;;  %6625 = vst [vmem:[#allocation27_spill] sm:$0xff] %v4865_v62  ;;  %v555_v54 = vrot.slane %v4834_v45, 1  ;;  %v4900_v35 = vld [vmem:[%s4654_s22 + $0x1a8] sm:$0xff]  ;;  %v4909_v38 = vld [vmem:[%s4654_s22 + $0x118] sm:$0xff] }
  0x2e   : > { %3827 = vmatpush3.bf16.xpose.msk.msra.mxu1 %vm4675_vm2, %v4811_v21  ;;  %6621 = vst [vmem:[#allocation23_spill] sm:$0xff] %v4849_v51  ;;  %6623 = vst [vmem:[#allocation25_spill] sm:$0xff] %v4856_v57  ;;  %v557_v2 = vrot.slane %v4840_v47, 1  ;;  %v595_v3 = vrot.slane %v4843_v49, 1  ;;  %v597_v4 = vrot.slane %v243_v50, 1  ;;  %v4874_v8 = vpack.c.bf16 %v625_v55, %v623_v53  ;;  %v4915_v41 = vld [vmem:[%s4654_s22 + $0x128] sm:$0xff] }
  0x2f   : > { %3830 = vmatprep.subr.msk.bf16.mxu1 %vm4675_vm2, %v4817_v27  ;;  %6626 = vst [vmem:[#allocation28_spill] sm:$0xff] %v4868_v1  ;;  %v4876_v9 = vpack.c.bf16 %v666_v59, %v664_v58  ;;  %v626_v10 = vrot.slane %v4854_v56, 1  ;;  %v627_v11 = vrot.slane %v4862_v61, 1  ;;  %v629_v12 = vrot.slane %v4865_v62, 1  ;;  %6629 = vst [vmem:[#allocation31_spill] sm:$0xff] %v4893_v31  ;;  %v4924_v58 = vld [vmem:[%s4654_s22 + $0x258] sm:$0xff] }
  0x30   : > { %6627 = vst [vmem:[#allocation29_spill] sm:$0xff] %v4874_v8  ;;  %v667_v17 = vrot.slane %v4868_v1, 1  ;;  %v669_v19 = vrot.slane %v283_v5, 1  ;;  %v556_v20 = vsel %vm535_vm1, %v554_v60, %v555_v54  ;;  %v558_v24 = vsel %vm535_vm1, %v555_v54, %v557_v2  ;;  %6630 = vst [vmem:[#allocation32_spill] sm:$0xff] %v4900_v35  ;;  %v263_v36 = vld [vmem:[%s4654_s22 + $0x1b0] sm:$0x1] }
  0x31   : > { %6628 = vst [vmem:[#allocation30_spill] sm:$0xff] %v4876_v9  ;;  %v596_v25 = vsel %vm535_vm1, %v593_v28, %v595_v3  ;;  %v598_v29 = vsel %vm535_vm1, %v595_v3, %v597_v4  ;;  %v628_v28 = vsel %vm535_vm1, %v626_v10, %v627_v11  ;;  %v630_v37 = vsel %vm535_vm1, %v627_v11, %v629_v12  ;;  %v4929_v4 = vld [vmem:[%s4654_s22 + $0x260] sm:$0xff]  ;;  %v4932_v5 = vld [vmem:[%s4654_s22 + $0x268] sm:$0xff]  ;;  %v5130_v1 = vld [vmem:[%s4654_s22 + $0x298] sm:$0xff] }
  0x32   : > { %v4917_v47 = vpack.c.bf16 %v558_v24, %v556_v20  ;;  %v4919_v50 = vpack.c.bf16 %v598_v29, %v596_v25  ;;  %v668_v53 = vsel %vm535_vm1, %v665_v42, %v667_v17  ;;  %v670_v55 = vsel %vm535_vm1, %v667_v17, %v669_v19  ;;  %v5050_v21 = vld [vmem:[%s4654_s22 + $0x460] sm:$0xff]  ;;  %6648 = vst [vmem:[#allocation50_spill] sm:$0xff] %v5130_v1  ;;  %v5151_v49 = vld [vmem:[%s4654_s22 + $0x3d8] sm:$0xff]  ;;  %v5176_v46 = vld [vmem:[%s4654_s22 + $0x490] sm:$0xff] }
  0x33   : > { %v559_v59 = vrot.slane %v4893_v31, 1  ;;  %v561_v60 = vrot.slane %v223_v34, 1  ;;  %v631_v54 = vrot.slane %v4900_v35, 1  ;;  %v633_v3 = vrot.slane %v263_v36, 1  ;;  %v313_v48 = vld [vmem:[%s4654_s22 + $0x340] sm:$0x1] }
  0x34   : > { %3785 = vmatpush3.bf16.xpose.msk.msra.mxu0 %vm4675_vm2, %v4849_v51  ;;  %6631 = vst [vmem:[#allocation33_spill] sm:$0xff] %v4917_v47  ;;  %6632 = vst [vmem:[#allocation34_spill] sm:$0xff] %v4919_v50  ;;  %v4934_v10 = vpack.c.bf16 %v630_v37, %v628_v28  ;;  %v599_v11 = vrot.slane %v4909_v38, 1  ;;  %v600_v42 = vrot.slane %v4912_v39, 1  ;;  %v602_v17 = vrot.slane %v4915_v41, 1  ;;  %v4955_v37 = vld [vmem:[%s4654_s22 + $0x78] sm:$0xff] }
  0x35   : > { %3788 = vmatprep.subr.msk.bf16.mxu0 %vm4675_vm2, %v4856_v57  ;;  %v4939_v19 = vpack.c.bf16 %v670_v55, %v668_v53  ;;  %v671_v20 = vrot.slane %v4924_v58, 1  ;;  %v672_v24 = vrot.slane %v4929_v4, 1  ;;  %v674_v25 = vrot.slane %v4932_v5, 1  ;;  %v268_v51 = vld [vmem:[%s4654_s22 + $0x1d8] sm:$0x1]  ;;  %6649 = vst [vmem:[#allocation51_spill] sm:$0xff] %v5151_v49 }
  0x36   : > { %3833 = vmatpush3.bf16.xpose.msk.msra.mxu1 %vm4675_vm2, %v4874_v8  ;;  %6633 = vst [vmem:[#allocation35_spill] sm:$0xff] %v4934_v10  ;;  %v560_v29 = vsel %vm535_vm1, %v557_v2, %v559_v59  ;;  %v562_v34 = vsel %vm535_vm1, %v559_v59, %v561_v60  ;;  %v632_v36 = vsel %vm535_vm1, %v629_v12, %v631_v54  ;;  %v4963_v2 = vld [vmem:[%s4654_s22 + $0x80] sm:$0xff]  ;;  %v4966_v59 = vld [vmem:[%s4654_s22 + $0x88] sm:$0xff]  ;;  %v4969_v12 = vld [vmem:[%s4654_s22 + $0x1b8] sm:$0xff]  ;;  %v563_v23 = vrot.slane %v4955_v37, 1 }
  0x37   : > { %3836 = vmatprep.subr.msk.bf16.mxu1 %vm4675_vm2, %v4876_v9  ;;  %6634 = vst [vmem:[#allocation36_spill] sm:$0xff] %v4939_v19  ;;  %v634_v28 = vsel %vm535_vm1, %v631_v54, %v633_v3  ;;  %v601_v53 = vsel %vm535_vm1, %v599_v11, %v600_v42  ;;  %v603_v55 = vsel %vm535_vm1, %v600_v42, %v602_v17  ;;  %v4975_v60 = vld [vmem:[%s4654_s22 + $0x1c0] sm:$0xff]  ;;  %v4978_v54 = vld [vmem:[%s4654_s22 + $0x130] sm:$0xff]  ;;  %v248_v3 = vld [vmem:[%s4654_s22 + $0x138] sm:$0x1] }
  0x38   : > { %v4981_v33 = vpack.c.bf16 %v562_v34, %v560_v29  ;;  %v4983_v11 = vpack.c.bf16 %v634_v28, %v632_v36  ;;  %v673_v42 = vsel %vm535_vm1, %v671_v20, %v672_v24  ;;  %v675_v32 = vsel %vm535_vm1, %v672_v24, %v674_v25  ;;  %v293_v61 = vld [vmem:[%s4654_s22 + $0x2a0] sm:$0x1]  ;;  %6656 = vst [vmem:[#allocation58_spill] sm:$0xff] %v5176_v46  ;;  %v5225_v43 = vld [vmem:[%s4654_s22 + $0x3f8] sm:$0xff] }
  0x39   : > { %v4994_v22 = vpack.c.bf16 %v603_v55, %v601_v53  ;;  %v564_v29 = vrot.slane %v4963_v2, 1  ;;  %v566_v34 = vrot.slane %v4966_v59, 1  ;;  %v635_v20 = vrot.slane %v4969_v12, 1  ;;  %6657 = vst [vmem:[#allocation59_spill] sm:$0xff] %v5179_v44  ;;  %6660 = vst [vmem:[#allocation62_spill] sm:$0xff] %v5197_v15  ;;  %v5228_v13 = vld [vmem:[%s4654_s22 + $0x360] sm:$0xff] }
  0x3a   : > { %6635 = vst [vmem:[#allocation37_spill] sm:$0xff] %v4981_v33  ;;  %6636 = vst [vmem:[#allocation38_spill] sm:$0xff] %v4983_v11  ;;  %v636_v24 = vrot.slane %v4975_v60, 1  ;;  %v604_v36 = vrot.slane %v4978_v54, 1  ;;  %v606_v28 = vrot.slane %v248_v3, 1  ;;  %v5002_v52 = vpack.c.bf16 %v675_v32, %v673_v42  ;;  %v5019_v42 = vld [vmem:[%s4654_s22 + $0x320] sm:$0xff] }
  0x3b   : > { %6637 = vst [vmem:[#allocation39_spill] sm:$0xff] %v4994_v22  ;;  %v638_v53 = vrot.slane %v4988_v7, 1  ;;  %v676_v55 = vrot.slane %v4991_v63, 1  ;;  %v565_v32 = vsel %vm535_vm1, %v563_v23, %v564_v29  ;;  %v567_v3 = vsel %vm535_vm1, %v564_v29, %v566_v34  ;;  %6665 = vst [vmem:[#allocation67_spill] sm:$0xff] %v5222_v26 }
  0x3c   : > { %3791 = vmatpush3.bf16.xpose.msk.msra.mxu0 %vm4675_vm2, %v4917_v47  ;;  %6638 = vst [vmem:[#allocation40_spill] sm:$0xff] %v5002_v52  ;;  %v5025_v47 = vld [vmem:[%s4654_s22 + $0x330] sm:$0xff]  ;;  %v607_v23 = vsel %vm535_vm1, %v604_v36, %v606_v28  ;;  %6666 = vst [vmem:[#allocation68_spill] sm:$0xff] %v5225_v43 }
  0x3d   : > { %3794 = vmatprep.subr.msk.bf16.mxu0 %vm4675_vm2, %v4919_v50  ;;  %v228_v50 = vld [vmem:[%s4654_s22 + $0x98] sm:$0x1]  ;;  %v639_v9 = vsel %vm535_vm1, %v636_v24, %v638_v53  ;;  %v677_v8 = vsel %vm535_vm1, %v674_v25, %v676_v55  ;;  %v719_v27 = vrot.slane %v5025_v47, 1  ;;  %v5055_v25 = vld [vmem:[%s4654_s22 + $0x468] sm:$0xff]  ;;  %6667 = vst [vmem:[#allocation69_spill] sm:$0xff] %v5228_v13 }
  0x3e   : > { %3839 = vmatpush3.bf16.xpose.msk.msra.mxu1 %vm4675_vm2, %v4934_v10  ;;  %v5007_v10 = vld [vmem:[%s4654_s22 + $0x90] sm:$0xff]  ;;  %v570_v57 = vrot.slane %v228_v50, 1 }
  0x3f   : > { %3842 = vmatprep.subr.msk.bf16.mxu1 %vm4675_vm2, %v4939_v19  ;;  %v678_v19 = vrot.slane %v288_v30, 1  ;;  %v5022_v30 = vld [vmem:[%s4654_s22 + $0x328] sm:$0xff]  ;;  %v568_v29 = vrot.slane %v5007_v10, 1  ;;  %v5058_v50 = vld [vmem:[%s4654_s22 + $0x470] sm:$0xff] }
  0x40   : > { %v717_v28 = vrot.slane %v5022_v30, 1 }
  0x44   : > { %3797 = vmatpush3.bf16.xpose.msk.msra.mxu0 %vm4675_vm2, %v4981_v33  ;;  %v637_v33 = vsel %vm535_vm1, %v635_v20, %v636_v24  ;;  %v5041_v20 = vld [vmem:[%s4654_s22 + $0x1d0] sm:$0xff] }
  0x45   : > { %3800 = vmatprep.subr.msk.bf16.mxu0 %vm4675_vm2, %v4994_v22  ;;  %v605_v22 = vsel %vm535_vm1, %v602_v17, %v604_v36  ;;  %v5043_v17 = vpack.c.bf16 %v567_v3, %v565_v32  ;;  %v716_v36 = vrot.slane %v5019_v42, 1  ;;  %v571_v32 = vsel %vm535_vm1, %v568_v29, %v570_v57 }
  0x46   : > { %3845 = vmatpush3.bf16.xpose.msk.msra.mxu1 %vm4675_vm2, %v4983_v11  ;;  %v679_v11 = vsel %vm535_vm1, %v676_v55, %v678_v19  ;;  %v5060_v19 = vpack.c.bf16 %v639_v9, %v637_v33  ;;  %v569_v55 = vsel %vm535_vm1, %v566_v34, %v568_v29  ;;  %v642_v3 = vrot.slane %v268_v51, 1  ;;  %v5079_v51 = vld [vmem:[%s4654_s22 + $0x280] sm:$0xff]  ;;  %v5085_v34 = vld [vmem:[%s4654_s22 + $0x290] sm:$0xff] }
  0x47   : > { %3848 = vmatprep.subr.msk.bf16.mxu1 %vm4675_vm2, %v5002_v52  ;;  %6639 = vst [vmem:[#allocation41_spill] sm:$0xff] %v5043_v17  ;;  %v5052_v52 = vpack.c.bf16 %v607_v23, %v605_v22  ;;  %v5062_v24 = vpack.c.bf16 %v679_v11, %v677_v8  ;;  %v640_v22 = vrot.slane %v5041_v20, 1  ;;  %v788_v23 = vrot.slane %v5050_v21, 1  ;;  %v5082_v11 = vld [vmem:[%s4654_s22 + $0x288] sm:$0xff]  ;;  %v5091_v29 = vld [vmem:[%s4654_s22 + $0x3c0] sm:$0xff] }
  0x48   : > { %6641 = vst [vmem:[#allocation43_spill] sm:$0xff] %v5060_v19  ;;  %v718_v33 = vsel %vm535_vm1, %v716_v36, %v717_v28  ;;  %v720_v8 = vsel %vm535_vm1, %v717_v28, %v719_v27  ;;  %v789_v9 = vrot.slane %v5055_v25, 1  ;;  %v791_v57 = vrot.slane %v5058_v50, 1  ;;  %v5094_v36 = vld [vmem:[%s4654_s22 + $0x3c8] sm:$0xff]  ;;  %v5097_v28 = vld [vmem:[%s4654_s22 + $0x3d0] sm:$0xff] }
  0x49   : > { %6640 = vst [vmem:[#allocation42_spill] sm:$0xff] %v5052_v52  ;;  %6642 = vst [vmem:[#allocation44_spill] sm:$0xff] %v5062_v24  ;;  %v643_v16 = vsel %vm535_vm1, %v640_v22, %v642_v3  ;;  %v5106_v6 = vpack.c.bf16 %v720_v8, %v718_v33  ;;  %v753_v3 = vrot.slane %v5094_v36, 1  ;;  %v755_v33 = vrot.slane %v5097_v28, 1  ;;  %v353_v8 = vld [vmem:[%s4654_s22 + $0x480] sm:$0x1] }
  0x4a   : > { %6643 = vst [vmem:[#allocation45_spill] sm:$0xff] %v5097_v28  ;;  %v790_v40 = vsel %vm535_vm1, %v788_v23, %v789_v9  ;;  %v792_v35 = vsel %vm535_vm1, %v789_v9, %v791_v57  ;;  %v723_v9 = vrot.slane %v313_v48, 1 }
  0x4b   : > { %6645 = vst [vmem:[#allocation47_spill] sm:$0xff] %v5106_v6  ;;  %v5127_v31 = vpack.c.bf16 %v792_v35, %v790_v40 }
  0x4c   : > { %3803 = vmatpush3.bf16.xpose.msk.msra.mxu0 %vm4675_vm2, %v5043_v17  ;;  %v641_v17 = vsel %vm535_vm1, %v638_v53, %v640_v22  ;;  %v683_v53 = vrot.slane %v5085_v34, 1  ;;  %v752_v22 = vrot.slane %v5091_v29, 1 }
  0x4d   : > { %3806 = vmatprep.subr.msk.bf16.mxu0 %vm4675_vm2, %v5052_v52  ;;  %v5102_v52 = vpack.c.bf16 %v571_v32, %v569_v55  ;;  %v681_v55 = vrot.slane %v5082_v11, 1  ;;  %v5117_v32 = vld [vmem:[%s4654_s22 + $0x478] sm:$0xff]  ;;  %v5124_v62 = vpack.c.bf16 %v643_v16, %v641_v17  ;;  %6647 = vst [vmem:[#allocation49_spill] sm:$0xff] %v5127_v31  ;;  %v795_v16 = vrot.slane %v353_v8, 1 }
  0x4e   : > { %3851 = vmatpush3.bf16.xpose.msk.msra.mxu1 %vm4675_vm2, %v5060_v19  ;;  %v5109_v19 = vld [vmem:[%s4654_s22 + $0x338] sm:$0xff]  ;;  %v793_v56 = vrot.slane %v5117_v32, 1  ;;  %v754_v35 = vsel %vm535_vm1, %v752_v22, %v753_v3  ;;  %v756_v17 = vsel %vm535_vm1, %v753_v3, %v755_v33  ;;  %v5155_v22 = vld [vmem:[%s4654_s22 + $0x348] sm:$0xff]  ;;  %v5161_v3 = vld [vmem:[%s4654_s22 + $0x350] sm:$0xff] }
  0x4f   : > { %3854 = vmatprep.subr.msk.bf16.mxu1 %vm4675_vm2, %v5062_v24  ;;  %6644 = vst [vmem:[#allocation46_spill] sm:$0xff] %v5102_v52  ;;  %v680_v24 = vrot.slane %v5079_v51, 1  ;;  %6646 = vst [vmem:[#allocation48_spill] sm:$0xff] %v5124_v62  ;;  %v721_v23 = vrot.slane %v5109_v19, 1  ;;  %v684_v48 = vsel %vm535_vm1, %v681_v55, %v683_v53  ;;  %v5168_v45 = vpack.c.bf16 %v756_v17, %v754_v35 }
  0x50   : > { %6650 = vst [vmem:[#allocation52_spill] sm:$0xff] %v5155_v22  ;;  %6651 = vst [vmem:[#allocation53_spill] sm:$0xff] %v5161_v3  ;;  %v725_v35 = vrot.slane %v5155_v22, 1 }
  0x51   : > { %v682_v40 = vsel %vm535_vm1, %v680_v24, %v681_v55  ;;  %v722_v8 = vsel %vm535_vm1, %v719_v27, %v721_v23  ;;  %v687_v24 = vrot.slane %v293_v61, 1  ;;  %v333_v55 = vld [vmem:[%s4654_s22 + $0x3e0] sm:$0x1]  ;;  %6654 = vst [vmem:[#allocation56_spill] sm:$0xff] %v5168_v45  ;;  %v796_v61 = vsel %vm535_vm1, %v793_v56, %v795_v16 }
  0x52   : > { %v5166_v27 = vpack.c.bf16 %v684_v48, %v682_v40  ;;  %v757_v40 = vrot.slane %v5151_v49, 1  ;;  %v759_v48 = vrot.slane %v333_v55, 1  ;;  %v726_v16 = vrot.slane %v5161_v3, 1  ;;  %v5265_v3 = vld [vmem:[%s4654_s22 + $0x400] sm:$0xff] }
  0x53   : > { %v798_v55 = vrot.slane %v5176_v46, 1  ;;  %6672 = vst [vmem:[#allocation74_spill] sm:$0xff] %v5265_v3  ;;  %v766_v49 = vrot.slane %v5265_v3, 1 }
  0x54   : > { %3809 = vmatpush3.bf16.xpose.msk.msra.mxu0 %vm4675_vm2, %v5102_v52  ;;  %v724_v52 = vsel %vm535_vm1, %v721_v23, %v723_v9  ;;  %6653 = vst [vmem:[#allocation55_spill] sm:$0xff] %v5166_v27  ;;  %v794_v23 = vsel %vm535_vm1, %v791_v57, %v793_v56  ;;  %v5173_v9 = vld [vmem:[%s4654_s22 + $0x488] sm:$0xff]  ;;  %v760_v14 = vsel %vm535_vm1, %v757_v40, %v759_v48 }
  0x55   : > { %3860 = vmatprep.subr.msk.bf16.mxu0 %vm4675_vm2, %v5106_v6  ;;  %v685_v6 = vrot.slane %v5130_v1, 1  ;;  %6655 = vst [vmem:[#allocation57_spill] sm:$0xff] %v5173_v9  ;;  %v5357_v1 = vld [vmem:[%s4654_s22 + $0x4c8] sm:$0xff] }
  0x56   : > { %3857 = vmatpush3.bf16.xpose.msk.msra.mxu1 %vm4675_vm2, %v5124_v62  ;;  %v5164_v62 = vld [vmem:[%s4654_s22 + $0x358] sm:$0xff] }
  0x57   : > { %3908 = vmatprep.subr.msk.bf16.mxu1 %vm4675_vm2, %v5127_v31  ;;  %6652 = vst [vmem:[#allocation54_spill] sm:$0xff] %v5164_v62  ;;  %v5181_v31 = vpack.c.bf16 %v724_v52, %v722_v8  ;;  %v686_v57 = vsel %vm535_vm1, %v683_v53, %v685_v6  ;;  %v688_v56 = vsel %vm535_vm1, %v685_v6, %v687_v24  ;;  %v728_v17 = vrot.slane %v5164_v62, 1  ;;  %v5203_v6 = vld [vmem:[%s4654_s22 + $0x2b0] sm:$0xff]  ;;  %v5206_v24 = vld [vmem:[%s4654_s22 + $0x2b8] sm:$0xff]  ;;  %v358_v62 = vld [vmem:[%s4654_s22 + $0x4a8] sm:$0x1] }
  0x58   : > { %v5191_v52 = vpack.c.bf16 %v796_v61, %v794_v23  ;;  %v797_v8 = vrot.slane %v5173_v9, 1  ;;  %v800_v53 = vrot.slane %v5179_v44, 1  ;;  %6661 = vst [vmem:[#allocation63_spill] sm:$0xff] %v5203_v6  ;;  %6662 = vst [vmem:[#allocation64_spill] sm:$0xff] %v5206_v24  ;;  %v5209_v23 = vld [vmem:[%s4654_s22 + $0x3e8] sm:$0xff]  ;;  %v5218_v61 = vpack.c.bf16 %v688_v56, %v686_v57 }
  0x59   : > { %6658 = vst [vmem:[#allocation60_spill] sm:$0xff] %v5181_v31  ;;  %6663 = vst [vmem:[#allocation65_spill] sm:$0xff] %v5209_v23  ;;  %v727_v44 = vsel %vm535_vm1, %v725_v35, %v726_v16  ;;  %v689_v57 = vrot.slane %v5197_v15, 1  ;;  %v318_v56 = vld [vmem:[%s4654_s22 + $0x368] sm:$0x1]  ;;  %v690_v35 = vrot.slane %v5203_v6, 1 }
  0x5a   : > { %6659 = vst [vmem:[#allocation61_spill] sm:$0xff] %v5191_v52  ;;  %6664 = vst [vmem:[#allocation66_spill] sm:$0xff] %v5218_v61  ;;  %v801_v48 = vsel %vm535_vm1, %v798_v55, %v800_v53  ;;  %v764_v15 = vrot.slane %v5225_v43, 1  ;;  %v804_v6 = vrot.slane %v358_v62, 1 }
  0x5b   : > { %3251 = vmatmul.mubr.msk.f32.vlgmr.msra.gmra.mrb[0].mxu0 %vm826_vm0, %v4642_v0  ;;  %v691_v43 = vsel %vm535_vm1, %v689_v57, %v690_v35  ;;  %v5285_v57 = vld [vmem:[%s4654_s22 + $0x380] sm:$0xff] }
  0x5c   : > { %3863 = vmatpush3.bf16.xpose.msk.msra.mxu0 %vm4675_vm2, %v5166_v27  ;;  %3318 = vmatprep.mubr.msk.f32.mxu0 %vm826_vm0, %v4642_v0  ;;  %v758_v27 = vsel %vm535_vm1, %v755_v33, %v757_v40  ;;  %v5239_v33 = vld [vmem:[%s4654_s22 + $0x4a0] sm:$0xff]  ;;  %v799_v40 = vsel %vm535_vm1, %v797_v8, %v798_v55  ;;  %v732_v8 = vrot.slane %v318_v56, 1  ;;  %v5275_v56 = vld [vmem:[%s4654_s22 + $0x378] sm:$0xff]  ;;  %6676 = vst [vmem:[#allocation78_spill] sm:$0xff] %v5285_v57 }
  0x5d   : > { %3285 = vmatmul.mubr.msk.f32.vlgmr.msra.gmra.mrb[0].mxu1 %vm826_vm0, %v4642_v0  ;;  %3866 = vmatprep.subr.msk.bf16.mxu0 %vm4675_vm2, %v5181_v31  ;;  %v729_v31 = vsel %vm535_vm1, %v726_v16, %v728_v17  ;;  %6668 = vst [vmem:[#allocation70_spill] sm:$0xff] %v5239_v33  ;;  %v692_v16 = vrot.slane %v5206_v24, 1  ;;  %v802_v55 = vrot.slane %v5239_v33, 1  ;;  %v5258_v9 = vpack.c.bf16 %v760_v14, %v758_v27  ;;  %v5261_v24 = vld [vmem:[%s4654_s22 + $0x2c0] sm:$0xff]  ;;  %v5291_v33 = vld [vmem:[%s4654_s22 + $0x4b8] sm:$0xff] }
  0x5e   : > { %3911 = vmatpush3.bf16.xpose.msk.msra.mxu1 %vm4675_vm2, %v5168_v45  ;;  %3352 = vmatprep.mubr.msk.f32.mxu1 %vm826_vm0, %v4642_v0  ;;  %v761_v45 = vrot.slane %v5209_v23, 1  ;;  %v762_v0 = vrot.slane %v5222_v26, 1  ;;  %v5255_v46 = vpack.c.bf16 %v729_v31, %v727_v44  ;;  %6671 = vst [vmem:[#allocation73_spill] sm:$0xff] %v5261_v24  ;;  %v298_v23 = vld [vmem:[%s4654_s22 + $0x2c8] sm:$0x1]  ;;  %v5267_v26 = vpack.c.bf16 %v801_v48, %v799_v40  ;;  %v5272_v31 = vld [vmem:[%s4654_s22 + $0x370] sm:$0xff] }
  0x5f   : > { %3914 = vmatprep.subr.msk.bf16.mxu1 %vm4675_vm2, %v5191_v52  ;;  %v730_v52 = vrot.slane %v5228_v13, 1  ;;  %6670 = vst [vmem:[#allocation72_spill] sm:$0xff] %v5258_v9  ;;  %v338_v44 = vld [vmem:[%s4654_s22 + $0x408] sm:$0x1]  ;;  %6674 = vst [vmem:[#allocation76_spill] sm:$0xff] %v5272_v31  ;;  %v693_v14 = vsel %vm535_vm1, %v690_v35, %v692_v16  ;;  %v5288_v48 = vld [vmem:[%s4654_s22 + $0x4b0] sm:$0xff] }
  0x60   : > { %6669 = vst [vmem:[#allocation71_spill] sm:$0xff] %v5255_v46  ;;  %6673 = vst [vmem:[#allocation75_spill] sm:$0xff] %v5267_v26  ;;  %v763_v62 = vsel %vm535_vm1, %v761_v45, %v762_v0  ;;  %v765_v27 = vsel %vm535_vm1, %v762_v0, %v764_v15  ;;  %v803_v45 = vsel %vm535_vm1, %v800_v53, %v802_v55  ;;  %v5304_v13 = vld [vmem:[%s4654_s22 + $0x2d0] sm:$0xff]  ;;  %v696_v22 = vrot.slane %v298_v23, 1  ;;  %v5312_v53 = vld [vmem:[%s4654_s22 + $0x2d8] sm:$0xff] }
  0x61   : > { %6675 = vst [vmem:[#allocation77_spill] sm:$0xff] %v5275_v56  ;;  %v731_v40 = vsel %vm535_vm1, %v728_v17, %v730_v52  ;;  %6677 = vst [vmem:[#allocation79_spill] sm:$0xff] %v5288_v48  ;;  %v733_v35 = vsel %vm535_vm1, %v730_v52, %v732_v8  ;;  %v805_v0 = vsel %vm535_vm1, %v802_v55, %v804_v6  ;;  %v694_v17 = vrot.slane %v5261_v24, 1  ;;  %v5315_v6 = vld [vmem:[%s4654_s22 + $0x2e0] sm:$0xff] }
  0x62   : > { %6678 = vst [vmem:[#allocation80_spill] sm:$0xff] %v5291_v33  ;;  %6680 = vst [vmem:[#allocation82_spill] sm:$0xff] %v5304_v13  ;;  %v734_v52 = vrot.slane %v5272_v31, 1  ;;  %v735_v8 = vrot.slane %v5275_v56, 1  ;;  %v737_v23 = vrot.slane %v5285_v57, 1  ;;  %v806_v55 = vrot.slane %v5288_v48, 1 }
  0x63   : > { %6681 = vst [vmem:[#allocation83_spill] sm:$0xff] %v5312_v53  ;;  %v5326_v31 = vpack.c.bf16 %v765_v27, %v763_v62  ;;  %v5329_v24 = vpack.c.bf16 %v733_v35, %v731_v40  ;;  %v699_v56 = vrot.slane %v5312_v53, 1  ;;  %v5335_v48 = vld [vmem:[%s4654_s22 + $0x410] sm:$0xff]  ;;  %v695_v62 = vsel %vm535_vm1, %v692_v16, %v694_v17  ;;  %v5349_v35 = vld [vmem:[%s4654_s22 + $0x388] sm:$0xff] }
  0x64   : > { %3869 = vmatpush3.bf16.xpose.msk.msra.mxu0 %vm4675_vm2, %v5218_v61  ;;  %v5301_v61 = vld [vmem:[%s4654_s22 + $0x4c0] sm:$0xff]  ;;  %v697_v27 = vsel %vm535_vm1, %v694_v17, %v696_v22  ;;  %v767_v40 = vsel %vm535_vm1, %v764_v15, %v766_v49  ;;  %v736_v57 = vsel %vm535_vm1, %v734_v52, %v735_v8  ;;  %v770_v22 = vrot.slane %v5335_v48, 1 }
  0x65   : > { %3872 = vmatprep.subr.msk.bf16.mxu0 %vm4675_vm2, %v5255_v46  ;;  %6679 = vst [vmem:[#allocation81_spill] sm:$0xff] %v5301_v61  ;;  %v768_v46 = vrot.slane %v338_v44, 1  ;;  %v807_v44 = vrot.slane %v5291_v33, 1  ;;  %6683 = vst [vmem:[#allocation85_spill] sm:$0xff] %v5326_v31  ;;  %v809_v3 = vrot.slane %v5301_v61, 1  ;;  %v5338_v33 = vld [vmem:[%s4654_s22 + $0x418] sm:$0xff] }
  0x66   : > { %3917 = vmatpush3.bf16.xpose.msk.msra.mxu1 %vm4675_vm2, %v5258_v9  ;;  %v5324_v9 = vpack.c.bf16 %v693_v14, %v691_v43  ;;  %6684 = vst [vmem:[#allocation86_spill] sm:$0xff] %v5329_v24  ;;  %v5341_v43 = vld [vmem:[%s4654_s22 + $0x420] sm:$0xff]  ;;  %v5343_v14 = vpack.c.bf16 %v805_v0, %v803_v45  ;;  %v323_v61 = vld [vmem:[%s4654_s22 + $0x390] sm:$0x1]  ;;  %v771_v16 = vrot.slane %v5338_v33, 1  ;;  %v6686_v0 = vrot.slane %v5315_v6, 1 }
  0x67   : > { %3920 = vmatprep.subr.msk.bf16.mxu1 %vm4675_vm2, %v5267_v26  ;;  %v698_v26 = vrot.slane %v5304_v13, 1  ;;  %v769_v53 = vsel %vm535_vm1, %v766_v49, %v768_v46  ;;  %v738_v13 = vsel %vm535_vm1, %v735_v8, %v737_v23  ;;  %v808_v28 = vsel %vm535_vm1, %v806_v55, %v807_v44  ;;  %v363_v45 = vld [vmem:[%s4654_s22 + $0x4d0] sm:$0x1] }
  0x68   : > { %6682 = vst [vmem:[#allocation84_spill] sm:$0xff] %v5324_v9  ;;  %6685 = vst [vmem:[#allocation87_spill] sm:$0xff] %v5343_v14  ;;  %v810_v15 = vsel %vm535_vm1, %v807_v44, %v809_v3  ;;  %v702_v17 = vsel %vm535_vm1, %v699_v56, %v6686_v0  ;;  %v739_v52 = vrot.slane %v5349_v35, 1  ;;  %v741_v8 = vrot.slane %v323_v61, 1 }
  0x69   : > { %v700_v49 = vsel %vm535_vm1, %v698_v26, %v699_v56  ;;  %v811_v55 = vrot.slane %v5357_v1, 1  ;;  %v813_v44 = vrot.slane %v363_v45, 1  ;;  %v5382_v46 = vpack.c.bf16 %v697_v27, %v695_v62 }
  0x6a   : > { %v5384_v26 = vpack.c.bf16 %v769_v53, %v767_v40  ;;  %v5388_v56 = vpack.c.bf16 %v810_v15, %v808_v28  ;;  %v5390_v61 = vpack.c.bf16 %v702_v17, %v700_v49  ;;  %v772_v0 = vsel %vm535_vm1, %v770_v22, %v771_v16  ;;  %v6705_v40 = vld [vmem:[#allocation54_spill] sm:$0xff]  ;;  %v6706_v15 = vld [vmem:[#allocation69_spill] sm:$0xff] }
  0x6b   : > { %6687 = vst [vmem:[#allocation88_spill] sm:$0xff] %v5382_v46  ;;  %v812_v62 = vsel %vm535_vm1, %v809_v3, %v811_v55  ;;  %v814_v53 = vsel %vm535_vm1, %v811_v55, %v813_v44  ;;  %v5406_v28 = vpack.c.bf16 %v4929_v4, %v4924_v58  ;;  %v5418_v3 = vpack.c.bf16 %v4978_v54, %v4915_v41  ;;  %v6697_v54 = vld [vmem:[#allocation52_spill] sm:$0xff]  ;;  %v6708_v49 = vld [vmem:[#allocation70_spill] sm:$0xff]  ;;  %v6710_v44 = vld [vmem:[#allocation73_spill] sm:$0xff] }
  0x6c   : > { %3875 = vmatpush3.bf16.xpose.msk.msra.mxu0 %vm4675_vm2, %v5324_v9  ;;  %6688 = vst [vmem:[#allocation89_spill] sm:$0xff] %v5384_v26  ;;  %6690 = vst [vmem:[#allocation91_spill] sm:$0xff] %v5388_v56  ;;  %v740_v9 = vsel %vm535_vm1, %v737_v23, %v739_v52  ;;  %v5433_v58 = vpack.c.bf16 %v5041_v20, %v4988_v7  ;;  %v5437_v41 = vpack.c.bf16 %v5022_v30, %v5019_v42  ;;  %v6698_v42 = vld [vmem:[#allocation53_spill] sm:$0xff]  ;;  %v6704_v23 = vld [vmem:[#allocation67_spill] sm:$0xff] }
  0x6d   : > { %3878 = vmatprep.subr.msk.bf16.mxu0 %vm4675_vm2, %v5329_v24  ;;  %v5386_v24 = vpack.c.bf16 %v738_v13, %v736_v57  ;;  %6691 = vst [vmem:[#allocation92_spill] sm:$0xff] %v5390_v61  ;;  %v5402_v13 = vpack.c.bf16 %v4912_v39, %v4909_v38  ;;  %v5414_v57 = vpack.c.bf16 %v4975_v60, %v4969_v12  ;;  %v6695_v12 = vld [vmem:[#allocation45_spill] sm:$0xff]  ;;  %v6696_v60 = vld [vmem:[#allocation51_spill] sm:$0xff]  ;;  %v6709_v55 = vld [vmem:[#allocation64_spill] sm:$0xff] }
  0x6e   : > { %3923 = vmatpush3.bf16.xpose.msk.msra.mxu1 %vm4675_vm2, %v5326_v31  ;;  %v6692_v31 = vrot.slane %v5341_v43, 1  ;;  %v5422_v38 = vpack.c.bf16 %v4991_v63, %v4932_v5  ;;  %v5429_v39 = vpack.c.bf16 %v5007_v10, %v4966_v59  ;;  %v5441_v63 = vpack.c.bf16 %v5055_v25, %v5050_v21  ;;  %v302_v10 = vld [vmem:[%s4654_s22 + $0x2e8] sm:$0xff]  ;;  %v6699_v20 = vld [vmem:[#allocation57_spill] sm:$0xff]  ;;  %v6700_v25 = vld [vmem:[#allocation58_spill] sm:$0xff] }
  0x6f   : > { %3926 = vmatprep.subr.msk.bf16.mxu1 %vm4675_vm2, %v5343_v14  ;;  %6689 = vst [vmem:[#allocation90_spill] sm:$0xff] %v5386_v24  ;;  %v742_v14 = vsel %vm535_vm1, %v739_v52, %v741_v8  ;;  %v5448_v4 = vpack.c.bf16 %v5082_v11, %v5079_v51  ;;  %v5452_v7 = vpack.c.bf16 %v5094_v36, %v5091_v29  ;;  %v5490_v51 = vld [vmem:[%s4654_s22 + $0x3a0] sm:$0xff]  ;;  %v5493_v11 = vld [vmem:[%s4654_s22 + $0x3a8] sm:$0xff]  ;;  %v343_v8 = vld [vmem:[%s4654_s22 + $0x430] sm:$0x1] }
  0x70   : > { %v774_v45 = vsel %vm535_vm1, %v771_v16, %v6692_v31  ;;  %v5410_v31 = vpack.c.bf16 %v4963_v2, %v4955_v37  ;;  %v5456_v5 = vpack.c.bf16 %v5109_v19, %v5025_v47  ;;  %v5460_v21 = vpack.c.bf16 %v5117_v32, %v5058_v50  ;;  %v303_v37 = vld [vmem:[%s4654_s22 + $0x2f0] sm:$0x1]  ;;  %v6694_v2 = vld [vmem:[#allocation50_spill] sm:$0xff]  ;;  %v5487_v19 = vld [vmem:[%s4654_s22 + $0x398] sm:$0xff] }
  0x71   : > { %v5469_v59 = vpack.c.bf16 %v6694_v2, %v5085_v34  ;;  %v5473_v47 = vpack.c.bf16 %v6696_v60, %v6695_v12  ;;  %v5477_v30 = vpack.c.bf16 %v6698_v42, %v6697_v54  ;;  %v5481_v50 = vpack.c.bf16 %v6700_v25, %v6699_v20  ;;  %v6701_v34 = vld [vmem:[#allocation62_spill] sm:$0xff]  ;;  %v6702_v29 = vld [vmem:[#allocation63_spill] sm:$0xff]  ;;  %v6703_v32 = vld [vmem:[#allocation65_spill] sm:$0xff] }
  0x72   : > { %6693 = vst [vmem:[#allocation93_spill] sm:$0xff] %v5460_v21  ;;  %v5497_v36 = vpack.c.bf16 %v6702_v29, %v6701_v34  ;;  %v5501_v27 = vpack.c.bf16 %v6704_v23, %v6703_v32  ;;  %v5505_v22 = vpack.c.bf16 %v6706_v15, %v6705_v40  ;;  %v6707_v16 = vld [vmem:[#allocation59_spill] sm:$0xff]  ;;  %v5517_v2 = vpack.c.bf16 %v6710_v44, %v6709_v55  ;;  %v6711_v12 = vld [vmem:[#allocation68_spill] sm:$0xff]  ;;  %v6712_v60 = vld [vmem:[#allocation74_spill] sm:$0xff] }
  0x73   : > { %v5509_v17 = vpack.c.bf16 %v6708_v49, %v6707_v16  ;;  %v5512_v52 = vld [vmem:[%s4654_s22 + $0x428] sm:$0xff]  ;;  %v5521_v54 = vpack.c.bf16 %v6712_v60, %v6711_v12  ;;  %v6713_v42 = vld [vmem:[#allocation76_spill] sm:$0xff]  ;;  %v6714_v20 = vld [vmem:[#allocation77_spill] sm:$0xff]  ;;  %v5531_v23 = vpack.c.bf16 %v742_v14, %v740_v9  ;;  %v703_v40 = vrot.slane %v302_v10, 1 }
  0x74   : > { %3881 = vmatpush3.bf16.xpose.msk.msra.mxu0 %vm4675_vm2, %v5382_v46  ;;  %v5525_v25 = vpack.c.bf16 %v6714_v20, %v6713_v42  ;;  %v6715_v34 = vld [vmem:[#allocation79_spill] sm:$0xff]  ;;  %v6716_v29 = vld [vmem:[#allocation80_spill] sm:$0xff]  ;;  %v705_v15 = vrot.slane %v303_v37, 1  ;;  %v5534_v16 = vld [vmem:[%s4654_s22 + $0x4d8] sm:$0xff]  ;;  %v5546_v42 = vpack.c.bf16 %v774_v45, %v772_v0  ;;  %v743_v20 = vrot.slane %v5487_v19, 1 }
  0x75   : > { %3884 = vmatprep.subr.msk.bf16.mxu0 %vm4675_vm2, %v5386_v24  ;;  %v5529_v32 = vpack.c.bf16 %v6716_v29, %v6715_v34  ;;  %6718 = vst [vmem:[#allocation45_spill] sm:$0xff] %v5531_v23  ;;  %v5537_v49 = vld [vmem:[%s4654_s22 + $0x4e0] sm:$0xff]  ;;  %v5540_v55 = vld [vmem:[%s4654_s22 + $0x4e8] sm:$0xff]  ;;  %v744_v34 = vrot.slane %v5490_v51, 1  ;;  %v746_v9 = vrot.slane %v5493_v11, 1  ;;  %v5551_v14 = vpack.c.bf16 %v814_v53, %v812_v62  ;;  %v327_v24 = vld [vmem:[%s4654_s22 + $0x3b0] sm:$0xff] }
  0x76   : > { %3929 = vmatpush3.bf16.xpose.msk.msra.mxu1 %vm4675_vm2, %v5384_v26  ;;  %v6719_v44 = vld [vmem:[#allocation82_spill] sm:$0xff]  ;;  %v6720_v12 = vld [vmem:[#allocation83_spill] sm:$0xff]  ;;  %6722 = vst [vmem:[#allocation52_spill] sm:$0xff] %v5546_v42  ;;  %v775_v37 = vrot.slane %v5512_v52, 1  ;;  %v777_v29 = vrot.slane %v343_v8, 1  ;;  %v815_v0 = vrot.slane %v5534_v16, 1  ;;  %v706_v8 = vsel %vm535_vm1, %v703_v40, %v705_v15 }
  0x77   : > { %3932 = vmatprep.subr.msk.bf16.mxu1 %vm4675_vm2, %v5388_v56  ;;  %6717 = vst [vmem:[#allocation50_spill] sm:$0xff] %v5529_v32  ;;  %v5544_v60 = vpack.c.bf16 %v6720_v12, %v6719_v44  ;;  %6723 = vst [vmem:[#allocation53_spill] sm:$0xff] %v5551_v14  ;;  %v816_v45 = vrot.slane %v5537_v49, 1  ;;  %v818_v44 = vrot.slane %v5540_v55, 1  ;;  %v5562_v12 = vpack.c.bf16 %v5338_v33, %v5335_v48  ;;  %v304_v48 = vld [vmem:[%s4654_s22 + $0x2f8] sm:$0xff]  ;;  %v305_v56 = vld [vmem:[%s4654_s22 + $0x300] sm:$0xff] }
  0x78   : > { %v6725_v62 = vrot.slane %v5315_v6, 1  ;;  %v747_v33 = vsel %vm535_vm1, %v744_v34, %v746_v9  ;;  %v6726_v26 = vld [vmem:[#allocation78_spill] sm:$0xff]  ;;  %v328_v46 = vld [vmem:[%s4654_s22 + $0x3b8] sm:$0x1] }
  0x79   : > { %6721 = vst [vmem:[#allocation51_spill] sm:$0xff] %v5544_v60  ;;  %6724 = vst [vmem:[#allocation57_spill] sm:$0xff] %v5562_v12  ;;  %v5608_v12 = vld [vmem:[%s4654_s22 + $0x448] sm:$0xff]  ;;  %v708_v60 = vrot.slane %v305_v56, 1  ;;  %v368_v32 = vld [vmem:[%s4654_s22 + $0x4f8] sm:$0x1] }
  0x7a   : > { %v704_v53 = vsel %vm535_vm1, %v6725_v62, %v703_v40  ;;  %v5583_v62 = vpack.c.bf16 %v5349_v35, %v6726_v26  ;;  %v6728_v40 = vld [vmem:[#allocation81_spill] sm:$0xff]  ;;  %v5599_v35 = vpack.c.bf16 %v302_v10, %v5315_v6  ;;  %v748_v10 = vrot.slane %v327_v24, 1 }
  0x7b   : > { %v5587_v15 = vpack.c.bf16 %v5357_v1, %v6728_v40  ;;  %v5601_v26 = vpack.c.bf16 %v706_v8, %v704_v53  ;;  %v817_v1 = vsel %vm535_vm1, %v815_v0, %v816_v45  ;;  %v819_v40 = vsel %vm535_vm1, %v816_v45, %v818_v44 }
  0x7c   : > { %3887 = vmatpush3.bf16.xpose.msk.msra.mxu0 %vm4675_vm2, %v5390_v61  ;;  %v745_v61 = vsel %vm535_vm1, %v743_v20, %v744_v34  ;;  %6727 = vst [vmem:[#allocation58_spill] sm:$0xff] %v5583_v62  ;;  %v6730_v20 = vrot.slane %v5341_v43, 1  ;;  %6731 = vst [vmem:[#allocation63_spill] sm:$0xff] %v5599_v35  ;;  %v750_v53 = vrot.slane %v328_v46, 1  ;;  %v5617_v0 = vpack.c.bf16 %v819_v40, %v817_v1 }
  0x7d   : > { %3890 = vmatprep.subr.msk.bf16.mxu0 %vm4675_vm2, %v5531_v23  ;;  %v5579_v23 = vld [vmem:[%s4654_s22 + $0x308] sm:$0xff]  ;;  %6729 = vst [vmem:[#allocation62_spill] sm:$0xff] %v5587_v15  ;;  %6732 = vst [vmem:[#allocation65_spill] sm:$0xff] %v5601_v26  ;;  %v345_v15 = vld [vmem:[%s4654_s22 + $0x440] sm:$0xff]  ;;  %v5610_v62 = vpack.c.bf16 %v747_v33, %v745_v61  ;;  %v782_v35 = vrot.slane %v5608_v12, 1  ;;  %v822_v33 = vrot.slane %v368_v32, 1  ;;  %v749_v32 = vsel %vm535_vm1, %v746_v9, %v748_v10 }
  0x7e   : > { %3935 = vmatpush3.bf16.xpose.msk.msra.mxu1 %vm4675_vm2, %v5546_v42  ;;  %v776_v34 = vsel %vm535_vm1, %v6730_v20, %v775_v37  ;;  %v778_v42 = vsel %vm535_vm1, %v775_v37, %v777_v29  ;;  %v707_v20 = vrot.slane %v304_v48, 1  ;;  %v710_v37 = vrot.slane %v5579_v23, 1  ;;  %v367_v29 = vld [vmem:[%s4654_s22 + $0x4f0] sm:$0xff]  ;;  %6735 = vst [vmem:[#allocation69_spill] sm:$0xff] %v5617_v0 }
  0x7f   : > { %3938 = vmatprep.subr.msk.bf16.mxu1 %vm4675_vm2, %v5551_v14  ;;  %v344_v14 = vld [vmem:[%s4654_s22 + $0x438] sm:$0xff]  ;;  %6733 = vst [vmem:[#allocation67_spill] sm:$0xff] %v5610_v62  ;;  %v5615_v6 = vpack.c.bf16 %v778_v42, %v776_v34  ;;  %v780_v8 = vrot.slane %v345_v15, 1  ;;  %v820_v61 = vrot.slane %v367_v29, 1  ;;  %v5625_v42 = vpack.c.bf16 %v5512_v52, %v5341_v43  ;;  %v307_v43 = vld [vmem:[%s4654_s22 + $0x310] sm:$0xff] }
  0x80   : > { %v779_v45 = vrot.slane %v344_v14, 1  ;;  %v709_v46 = vsel %vm535_vm1, %v707_v20, %v708_v60  ;;  %v711_v34 = vsel %vm535_vm1, %v708_v60, %v710_v37  ;;  %v751_v1 = vsel %vm535_vm1, %v748_v10, %v750_v53  ;;  %v308_v52 = vld [vmem:[%s4654_s22 + $0x318] sm:$0x1] }
  0x81   : > { %6734 = vst [vmem:[#allocation54_spill] sm:$0xff] %v5615_v6  ;;  %v5641_v40 = vpack.c.bf16 %v5490_v51, %v5487_v19  ;;  %v5645_v20 = vpack.c.bf16 %v5537_v49, %v5534_v16  ;;  %v783_v9 = vsel %vm535_vm1, %v780_v8, %v782_v35  ;;  %v5654_v10 = vpack.c.bf16 %v711_v34, %v709_v46  ;;  %v347_v51 = vld [vmem:[%s4654_s22 + $0x450] sm:$0xff]  ;;  %v4568_v46 = vld [vmem:[%s4654_s22 + $0x1e8] sm:$0xff] }
  0x82   : > { %v781_v60 = vsel %vm535_vm1, %v779_v45, %v780_v8  ;;  %v821_v53 = vsel %vm535_vm1, %v818_v44, %v820_v61  ;;  %v823_v19 = vsel %vm535_vm1, %v820_v61, %v822_v33  ;;  %v5660_v16 = vpack.c.bf16 %v751_v1, %v749_v32  ;;  %v4569_v34 = vld [vmem:[%s4654_s22 + $0xb0] sm:$0xff]  ;;  %v4570_v32 = vld [vmem:[%s4654_s22 + $0xb8] sm:$0xff] }
  0x83   : > { %6736 = vst [vmem:[#allocation59_spill] sm:$0xff] %v5645_v20  ;;  %6737 = vst [vmem:[#allocation70_spill] sm:$0xff] %v5654_v10  ;;  %v712_v49 = vrot.slane %v307_v43, 1  ;;  %v5662_v20 = vpack.c.bf16 %v783_v9, %v781_v60  ;;  %v784_v45 = vrot.slane %v347_v51, 1  ;;  %v5669_v44 = vpack.c.bf16 %v345_v15, %v344_v14  ;;  %v4573_v60 = vld [vmem:[%s4654_s22 + $0x1f8] sm:$0xff] }
  0x84   : > { %3893 = vmatpush3.bf16.xpose.msk.msra.mxu0 %vm4675_vm2, %v5601_v26  ;;  %6738 = vst [vmem:[#allocation64_spill] sm:$0xff] %v5660_v16  ;;  %v714_v26 = vrot.slane %v308_v52, 1  ;;  %v5683_v14 = vpack.c.bf16 %v367_v29, %v5540_v55  ;;  %v4567_v29 = vld [vmem:[%s4654_s22 + $0x1e0] sm:$0xff]  ;;  %v5722_v1 = vpack.c.bf16 %v4570_v32, %v4569_v34  ;;  %v4572_v52 = vld [vmem:[%s4654_s22 + $0x1f0] sm:$0xff]  ;;  %v4578_v34 = vld [vmem:[%s4654_s22 + $0x28] sm:$0xff] }
  0x85   : > { %3896 = vmatprep.subr.msk.bf16.mxu0 %vm4675_vm2, %v5610_v62  ;;  %v348_v62 = vld [vmem:[%s4654_s22 + $0x458] sm:$0x1]  ;;  %6739 = vst [vmem:[#allocation73_spill] sm:$0xff] %v5662_v20  ;;  %v785_v15 = vsel %vm535_vm1, %v782_v35, %v784_v45  ;;  %v5703_v35 = vpack.c.bf16 %v4568_v46, %v4567_v29  ;;  %v5735_v9 = vpack.c.bf16 %v4573_v60, %v4572_v52  ;;  %v4579_v32 = vld [vmem:[%s4654_s22 + $0x30] sm:$0xff]  ;;  %v4581_v60 = vld [vmem:[%s4654_s22 + $0xe0] sm:$0xff] }
  0x86   : > { %3941 = vmatpush3.bf16.xpose.msk.msra.mxu1 %vm4675_vm2, %v5615_v6  ;;  %v5652_v6 = vpack.c.bf16 %v305_v56, %v304_v48  ;;  %v786_v56 = vrot.slane %v348_v62, 1  ;;  %v713_v48 = vsel %vm535_vm1, %v710_v37, %v712_v49  ;;  %v715_v8 = vsel %vm535_vm1, %v712_v49, %v714_v26  ;;  %v6746_v49 = vld [vmem:[#allocation8_spill] sm:$0xff]  ;;  %v6750_v46 = vld [vmem:[#allocation9_spill] sm:$0xff] }
  0x87   : > { %3944 = vmatprep.subr.msk.bf16.mxu1 %vm4675_vm2, %v5617_v0  ;;  %v5664_v0 = vpack.c.bf16 %v823_v19, %v821_v53  ;;  %v5680_v62 = vpack.c.bf16 %v327_v24, %v5493_v11  ;;  %v5691_v26 = vpack.c.bf16 %v307_v43, %v5579_v23  ;;  %v5693_v61 = vpack.c.bf16 %v715_v8, %v713_v48  ;;  %v4565_v24 = vld [vmem:[%s4654_s22 + $0xa0] sm:$0xff]  ;;  %v4566_v11 = vld [vmem:[%s4654_s22 + $0xa8] sm:$0xff]  ;;  %v4580_v52 = vld [vmem:[%s4654_s22 + $0xd8] sm:$0xff] }
  0x88   : > { %v787_v37 = vsel %vm535_vm1, %v784_v45, %v786_v56  ;;  %v5697_v33 = vpack.c.bf16 %v4566_v11, %v4565_v24  ;;  %v5709_v23 = vpack.c.bf16 %v347_v51, %v5608_v12  ;;  %v5727_v12 = vld [vmem:[%s6482_s1] sm:$0xff]  ;;  %v4571_v43 = vld [vmem:[%s6482_s1 + $0x8] sm:$0xff]  ;;  %v4575_v56 = vld [vmem:[%s4654_s22 + $0xd0] sm:$0xff] }
  0x89   : > { %6740 = vst [vmem:[#allocation68_spill] sm:$0xff] %v5664_v0  ;;  %6741 = vst [vmem:[#allocation74_spill] sm:$0xff] %v5693_v61  ;;  %v5699_v55 = vpack.c.bf16 %v787_v37, %v785_v15  ;;  %v6743_v53 = vld [vmem:[#allocation3_spill] sm:$0xff]  ;;  %v6744_v19 = vld [vmem:[#allocation2_spill] sm:$0xff] }
  0x8a   : > { %v6745_v51 = vpack.c.bf16 %v6743_v53, %v6744_v19  ;;  %v4574_v45 = vld [vmem:[%s4654_s22 + $0xc8] sm:$0xff]  ;;  %v4577_v15 = vld [vmem:[%s4654_s22 + $0x210] sm:$0xff]  ;;  %v6747_v24 = vld [vmem:[#allocation6_spill] sm:$0xff]  ;;  %v5784_v53 = vpack.c.bf16 %v4581_v60, %v4580_v52 }
  0x8b   : > { %6742 = vst [vmem:[#allocation76_spill] sm:$0xff] %v5699_v55  ;;  %v5758_v48 = vpack.c.bf16 %v4575_v56, %v4574_v45  ;;  %v4576_v8 = vld [vmem:[%s4654_s22 + $0x208] sm:$0xff]  ;;  %v6748_v11 = vld [vmem:[#allocation4_spill] sm:$0xff]  ;;  %v4584_v56 = vld [vmem:[%s4654_s22 + $0x218] sm:$0xff] }
  0x8c   : > { %3899 = vmatpush3.bf16.xpose.msk.msra.mxu0 %vm4675_vm2, %v5654_v10  ;;  %v5762_v37 = vpack.c.bf16 %v4577_v15, %v4576_v8  ;;  %v6749_v29 = vpack.c.bf16 %v6747_v24, %v6748_v11  ;;  %v4582_v19 = vld [vmem:[%s4654_s22 + $0x168] sm:$0xff]  ;;  %v4585_v8 = vld [vmem:[%s4654_s22 + $0x220] sm:$0xff]  ;;  %v4586_v24 = vld [vmem:[%s4654_s22 + $0x38] sm:$0xff] }
  0x8d   : > { %3902 = vmatprep.subr.msk.bf16.mxu0 %vm4675_vm2, %v5660_v16  ;;  %v5792_v15 = vpack.c.bf16 %v4585_v8, %v4584_v56  ;;  %v4587_v11 = vld [vmem:[%s4654_s22 + $0x40] sm:$0xff]  ;;  %v4590_v60 = vld [vmem:[%s4654_s22 + $0x178] sm:$0xff]  ;;  %v4592_v56 = vld [vmem:[%s4654_s22 + $0x230] sm:$0xff] }
  0x8e   : > { %3947 = vmatpush3.bf16.xpose.msk.msra.mxu1 %vm4675_vm2, %v5662_v20  ;;  %v4593_v8 = vld [vmem:[%s4654_s22 + $0x238] sm:$0xff]  ;;  %v6756_v20 = vld [vmem:[#allocation28_spill] sm:$0xff]  ;;  %v6766_v10 = vld [vmem:[#allocation59_spill] sm:$0xff] }
  0x8f   : > { %3950 = vmatprep.subr.msk.bf16.mxu1 %vm4675_vm2, %v5664_v0  ;;  %v4595_v0 = vld [vmem:[%s4654_s22 + $0x240] sm:$0xff] }
  0x90   : > { %v5848_v16 = vpack.c.bf16 %v6756_v20, %v4595_v0  ;;  %v6758_v20 = vld [vmem:[#allocation27_spill] sm:$0xff] }
  0x94   : > { %3905 = vmatpush3.bf16.xpose.msk.msra.mxu0 %vm4675_vm2, %v5693_v61 }
  0x95   : > { %3956 = vmatprep.subr.msk.bf16.mxu0 %vm4675_vm2, %v5697_v33 }
  0x96   : > { %3953 = vmatpush3.bf16.xpose.msk.msra.mxu1 %vm4675_vm2, %v5699_v55  ;;  %v5820_v55 = vpack.c.bf16 %v4593_v8, %v4592_v56  ;;  %v6754_v56 = vld [vmem:[#allocation24_spill] sm:$0xff]  ;;  %v6755_v8 = vld [vmem:[#allocation26_spill] sm:$0xff] }
  0x97   : > { %4004 = vmatprep.subr.msk.bf16.mxu1 %vm4675_vm2, %v5703_v35  ;;  %v5844_v61 = vpack.c.bf16 %v6755_v8, %v6754_v56  ;;  %v6760_v56 = vld [vmem:[#allocation50_spill] sm:$0xff]  ;;  %v6761_v8 = vld [vmem:[#allocation51_spill] sm:$0xff] }
  0x9b   : > { %3319 = vmatmul.mubr.msk.f32.vlgmr.msra.gmra.mrb[2].mxu0 %vm826_vm0, %v4571_v43 }
  0x9c   : > { %3959 = vmatpush3.bf16.xpose.msk.msra.mxu0 %vm4675_vm2, %v6745_v51  ;;  %3386 = vmatprep.mubr.msk.f32.mxu0 %vm826_vm0, %v5727_v12  ;;  %v4583_v51 = vld [vmem:[%s4654_s22 + $0x170] sm:$0xff] }
  0x9d   : > { %3353 = vmatmul.mubr.msk.f32.vlgmr.msra.gmra.mrb[2].mxu1 %vm826_vm0, %v4571_v43  ;;  %3962 = vmatprep.subr.msk.bf16.mxu0 %vm4675_vm2, %v5722_v1  ;;  %v5780_v43 = vpack.c.bf16 %v4579_v32, %v4578_v34  ;;  %v5788_v45 = vpack.c.bf16 %v4583_v51, %v4582_v19  ;;  %v4588_v34 = vld [vmem:[%s4654_s22 + $0xf0] sm:$0xff]  ;;  %v4589_v32 = vld [vmem:[%s4654_s22 + $0xf8] sm:$0xff]  ;;  %v4591_v19 = vld [vmem:[%s4654_s22 + $0x180] sm:$0xff] }
  0x9e   : > { %4007 = vmatpush3.bf16.xpose.msk.msra.mxu1 %vm4675_vm2, %v6746_v49  ;;  %3420 = vmatprep.mubr.msk.f32.mxu1 %vm826_vm0, %v5727_v12  ;;  %v5812_v52 = vpack.c.bf16 %v4589_v32, %v4588_v34  ;;  %v5816_v51 = vpack.c.bf16 %v4591_v19, %v4590_v60  ;;  %v4594_v32 = vld [vmem:[%s4654_s22 + $0x100] sm:$0xff] }
  0x9f   : > { %4010 = vmatprep.subr.msk.bf16.mxu1 %vm4675_vm2, %v5735_v9  ;;  %v6753_v60 = vld [vmem:[#allocation22_spill] sm:$0xff] }
  0xa0   : > { %v5840_v19 = vpack.c.bf16 %v6753_v60, %v4594_v32  ;;  %v6759_v32 = vld [vmem:[#allocation32_spill] sm:$0xff] }
  0xa1   : > { %v5868_v60 = vpack.c.bf16 %v6759_v32, %v6758_v20  ;;  %v6764_v20 = vld [vmem:[#allocation62_spill] sm:$0xff]  ;;  %v6765_v32 = vld [vmem:[#allocation63_spill] sm:$0xff] }
  0xa4   : > { %3965 = vmatpush3.bf16.xpose.msk.msra.mxu0 %vm4675_vm2, %v6749_v29  ;;  %v5808_v29 = vpack.c.bf16 %v4587_v11, %v4586_v24  ;;  %v6751_v24 = vld [vmem:[#allocation20_spill] sm:$0xff]  ;;  %v6752_v11 = vld [vmem:[#allocation21_spill] sm:$0xff] }
  0xa5   : > { %3968 = vmatprep.subr.msk.bf16.mxu0 %vm4675_vm2, %v5758_v48  ;;  %v5836_v34 = vpack.c.bf16 %v6752_v11, %v6751_v24  ;;  %v4596_v24 = vld [vmem:[%s4654_s22 + $0x60] sm:$0xff]  ;;  %v6757_v11 = vld [vmem:[#allocation31_spill] sm:$0xff] }
  0xa6   : > { %4013 = vmatpush3.bf16.xpose.msk.msra.mxu1 %vm4675_vm2, %v6750_v46  ;;  %v5864_v0 = vpack.c.bf16 %v6757_v11, %v4596_v24  ;;  %v6762_v24 = vld [vmem:[#allocation58_spill] sm:$0xff]  ;;  %v6763_v11 = vld [vmem:[#allocation57_spill] sm:$0xff] }
  0xa7   : > { %4016 = vmatprep.subr.msk.bf16.mxu1 %vm4675_vm2, %v5762_v37 }
  0xac   : > { %3971 = vmatpush3.bf16.xpose.msk.msra.mxu0 %vm4675_vm2, %v5780_v43 }
  0xad   : > { %3974 = vmatprep.subr.msk.bf16.mxu0 %vm4675_vm2, %v5784_v53 }
  0xae   : > { %4019 = vmatpush3.bf16.xpose.msk.msra.mxu1 %vm4675_vm2, %v5788_v45 }
  0xaf   : > { %4022 = vmatprep.subr.msk.bf16.mxu1 %vm4675_vm2, %v5792_v15 }
  0xb4   : > { %3977 = vmatpush3.bf16.xpose.msk.msra.mxu0 %vm4675_vm2, %v5808_v29 }
  0xb5   : > { %3980 = vmatprep.subr.msk.bf16.mxu0 %vm4675_vm2, %v5812_v52 }
  0xb6   : > { %4025 = vmatpush3.bf16.xpose.msk.msra.mxu1 %vm4675_vm2, %v5816_v51 }
  0xb7   : > { %4028 = vmatprep.subr.msk.bf16.mxu1 %vm4675_vm2, %v5820_v55 }
  0xbc   : > { %3983 = vmatpush3.bf16.xpose.msk.msra.mxu0 %vm4675_vm2, %v5836_v34 }
  0xbd   : > { %3986 = vmatprep.subr.msk.bf16.mxu0 %vm4675_vm2, %v5840_v19 }
  0xbe   : > { %4031 = vmatpush3.bf16.xpose.msk.msra.mxu1 %vm4675_vm2, %v5844_v61 }
  0xbf   : > { %4034 = vmatprep.subr.msk.bf16.mxu1 %vm4675_vm2, %v5848_v16 }
  0xc4   : > { %3989 = vmatpush3.bf16.xpose.msk.msra.mxu0 %vm4675_vm2, %v5864_v0 }
  0xc5   : > { %3992 = vmatprep.subr.msk.bf16.mxu0 %vm4675_vm2, %v5402_v13 }
  0xc6   : > { %4037 = vmatpush3.bf16.xpose.msk.msra.mxu1 %vm4675_vm2, %v5868_v60 }
  0xc7   : > { %4040 = vmatprep.subr.msk.bf16.mxu1 %vm4675_vm2, %v5406_v28 }
  0xcc   : > { %3995 = vmatpush3.bf16.xpose.msk.msra.mxu0 %vm4675_vm2, %v5410_v31 }
  0xcd   : > { %3998 = vmatprep.subr.msk.bf16.mxu0 %vm4675_vm2, %v5418_v3 }
  0xce   : > { %4043 = vmatpush3.bf16.xpose.msk.msra.mxu1 %vm4675_vm2, %v5414_v57 }
  0xcf   : > { %4046 = vmatprep.subr.msk.bf16.mxu1 %vm4675_vm2, %v5422_v38 }
  0xd4   : > { %4001 = vmatpush3.bf16.xpose.msk.msra.mxu0 %vm4675_vm2, %v5429_v39 }
  0xd5   : > { %4052 = vmatprep.subr.msk.bf16.mxu0 %vm4675_vm2, %v5437_v41 }
  0xd6   : > { %4049 = vmatpush3.bf16.xpose.msk.msra.mxu1 %vm4675_vm2, %v5433_v58 }
  0xd7   : > { %4100 = vmatprep.subr.msk.bf16.mxu1 %vm4675_vm2, %v5441_v63 }
  0xdb   : > { %3387 = vmatmul.mubr.msk.f32.vlgmr.msra.gmra.mrb[0].mxu0 %vm826_vm0, %v5727_v12 }
  0xdc   : > { %4055 = vmatpush3.bf16.xpose.msk.msra.mxu0 %vm4675_vm2, %v5448_v4  ;;  %3454 = vmatprep.mubr.msk.f32.mxu0 %vm826_vm0, %v5727_v12 }
  0xdd   : > { %3421 = vmatmul.mubr.msk.f32.vlgmr.msra.gmra.mrb[0].mxu1 %vm826_vm0, %v5727_v12  ;;  %4058 = vmatprep.subr.msk.bf16.mxu0 %vm4675_vm2, %v5456_v5 }
  0xde   : > { %4103 = vmatpush3.bf16.xpose.msk.msra.mxu1 %vm4675_vm2, %v5452_v7  ;;  %3488 = vmatprep.mubr.msk.f32.mxu1 %vm826_vm0, %v5727_v12 }
  0xdf   : > { %4106 = vmatprep.subr.msk.bf16.mxu1 %vm4675_vm2, %v5460_v21  ;;  %v6013_v21 = vld [vmem:[%s6482_s1 + $0x10] sm:$0xff] }
  0xe4   : > { %4061 = vmatpush3.bf16.xpose.msk.msra.mxu0 %vm4675_vm2, %v5469_v59 }
  0xe5   : > { %4064 = vmatprep.subr.msk.bf16.mxu0 %vm4675_vm2, %v5477_v30 }
  0xe6   : > { %4109 = vmatpush3.bf16.xpose.msk.msra.mxu1 %vm4675_vm2, %v5473_v47 }
  0xe7   : > { %4112 = vmatprep.subr.msk.bf16.mxu1 %vm4675_vm2, %v5481_v50 }
  0xec   : > { %4067 = vmatpush3.bf16.xpose.msk.msra.mxu0 %vm4675_vm2, %v5497_v36 }
  0xed   : > { %4070 = vmatprep.subr.msk.bf16.mxu0 %vm4675_vm2, %v5505_v22 }
  0xee   : > { %4115 = vmatpush3.bf16.xpose.msk.msra.mxu1 %vm4675_vm2, %v5501_v27 }
  0xef   : > { %4118 = vmatprep.subr.msk.bf16.mxu1 %vm4675_vm2, %v5509_v17 }
  0xf4   : > { %4073 = vmatpush3.bf16.xpose.msk.msra.mxu0 %vm4675_vm2, %v5517_v2 }
  0xf5   : > { %4076 = vmatprep.subr.msk.bf16.mxu0 %vm4675_vm2, %v5525_v25 }
  0xf6   : > { %4121 = vmatpush3.bf16.xpose.msk.msra.mxu1 %vm4675_vm2, %v5521_v54 }
  0xf7   : > { %4124 = vmatprep.subr.msk.bf16.mxu1 %vm4675_vm2, %v6760_v56 }
  0xfc   : > { %4079 = vmatpush3.bf16.xpose.msk.msra.mxu0 %vm4675_vm2, %v6761_v8 }
  0xfd   : > { %4082 = vmatprep.subr.msk.bf16.mxu0 %vm4675_vm2, %v6762_v24 }
  0xfe   : > { %4127 = vmatpush3.bf16.xpose.msk.msra.mxu1 %vm4675_vm2, %v6763_v11 }
  0xff   : > { %4130 = vmatprep.subr.msk.bf16.mxu1 %vm4675_vm2, %v6764_v20 }
 0x104   : > { %4085 = vmatpush3.bf16.xpose.msk.msra.mxu0 %vm4675_vm2, %v6765_v32 }
 0x105   : > { %4088 = vmatprep.subr.msk.bf16.mxu0 %vm4675_vm2, %v5641_v40 }
 0x106   : > { %4133 = vmatpush3.bf16.xpose.msk.msra.mxu1 %vm4675_vm2, %v5625_v42 }
 0x107   : > { %4136 = vmatprep.subr.msk.bf16.mxu1 %vm4675_vm2, %v6766_v10 }
 0x10c   : > { %4091 = vmatpush3.bf16.xpose.msk.msra.mxu0 %vm4675_vm2, %v5652_v6 }
 0x10d   : > { %4094 = vmatprep.subr.msk.bf16.mxu0 %vm4675_vm2, %v5680_v62 }
 0x10e   : > { %4139 = vmatpush3.bf16.xpose.msk.msra.mxu1 %vm4675_vm2, %v5669_v44 }
 0x10f   : > { %4142 = vmatprep.subr.msk.bf16.mxu1 %vm4675_vm2, %v5683_v14 }
 0x114   : > { %4097 = vmatpush3.bf16.xpose.msk.msra.mxu0 %vm4675_vm2, %v5691_v26 }
 0x115   : > { %4148 = vmatprep.subr.msk.bf16.mxu0 %vm4675_vm2, %v5758_v48  ;;  %v6789_v48 = vld [vmem:[#allocation44_spill] sm:$0xff] }
 0x116   : > { %4145 = vmatpush3.bf16.xpose.msk.msra.mxu1 %vm4675_vm2, %v5709_v23 }
 0x117   : > { %4196 = vmatprep.subr.msk.bf16.mxu1 %vm4675_vm2, %v5762_v37  ;;  %v6790_v37 = vld [vmem:[#allocation46_spill] sm:$0xff] }
 0x11b   : > { %3455 = vmatmul.mubr.msk.f32.vlgmr.msra.gmra.mrb[2].mxu0 %vm826_vm0, %v5727_v12 }
 0x11c   : > { %4151 = vmatpush3.bf16.xpose.msk.msra.mxu0 %vm4675_vm2, %v5780_v43  ;;  %3522 = vmatprep.mubr.msk.f32.mxu0 %vm826_vm0, %v6013_v21  ;;  %v6792_v43 = vld [vmem:[#allocation48_spill] sm:$0xff] }
 0x11d   : > { %3489 = vmatmul.mubr.msk.f32.vlgmr.msra.gmra.mrb[2].mxu1 %vm826_vm0, %v5727_v12  ;;  %4154 = vmatprep.subr.msk.bf16.mxu0 %vm4675_vm2, %v5784_v53  ;;  %v6786_v12 = vld [vmem:[#allocation41_spill] sm:$0xff]  ;;  %v6793_v53 = vld [vmem:[#allocation55_spill] sm:$0xff] }
 0x11e   : > { %4199 = vmatpush3.bf16.xpose.msk.msra.mxu1 %vm4675_vm2, %v5788_v45  ;;  %3556 = vmatprep.mubr.msk.f32.mxu1 %vm826_vm0, %v6013_v21  ;;  %v6794_v45 = vld [vmem:[#allocation5_spill] sm:$0xff] }
 0x11f   : > { %4202 = vmatprep.subr.msk.bf16.mxu1 %vm4675_vm2, %v5792_v15  ;;  %v6795_v15 = vld [vmem:[#allocation13_spill] sm:$0xff] }
 0x124   : > { %4157 = vmatpush3.bf16.xpose.msk.msra.mxu0 %vm4675_vm2, %v5808_v29  ;;  %v6796_v29 = vld [vmem:[#allocation7_spill] sm:$0xff] }
 0x125   : > { %4160 = vmatprep.subr.msk.bf16.mxu0 %vm4675_vm2, %v5812_v52  ;;  %v6797_v52 = vld [vmem:[#allocation66_spill] sm:$0xff] }
 0x126   : > { %4205 = vmatpush3.bf16.xpose.msk.msra.mxu1 %vm4675_vm2, %v5816_v51  ;;  %v6798_v51 = vld [vmem:[#allocation11_spill] sm:$0xff] }
 0x127   : > { %4208 = vmatprep.subr.msk.bf16.mxu1 %vm4675_vm2, %v5820_v55  ;;  %v6782_v55 = vld [vmem:[#allocation37_spill] sm:$0xff] }
 0x12c   : > { %4163 = vmatpush3.bf16.xpose.msk.msra.mxu0 %vm4675_vm2, %v5836_v34  ;;  %v6799_v34 = vld [vmem:[#allocation71_spill] sm:$0xff] }
 0x12d   : > { %4166 = vmatprep.subr.msk.bf16.mxu0 %vm4675_vm2, %v5840_v19  ;;  %v6800_v19 = vld [vmem:[#allocation12_spill] sm:$0xff] }
 0x12e   : > { %4211 = vmatpush3.bf16.xpose.msk.msra.mxu1 %vm4675_vm2, %v5844_v61  ;;  %v6780_v61 = vld [vmem:[#allocation35_spill] sm:$0xff] }
 0x12f   : > { %4214 = vmatprep.subr.msk.bf16.mxu1 %vm4675_vm2, %v5848_v16  ;;  %v6775_v16 = vld [vmem:[#allocation25_spill] sm:$0xff] }
 0x134   : > { %4169 = vmatpush3.bf16.xpose.msk.msra.mxu0 %vm4675_vm2, %v5864_v0  ;;  %v6801_v0 = vld [vmem:[#allocation75_spill] sm:$0xff] }
 0x135   : > { %4172 = vmatprep.subr.msk.bf16.mxu0 %vm4675_vm2, %v5402_v13  ;;  %v369_v13 = vld [vmem:[%s4654_s22 + $0x500] sm:$0xff] }
 0x136   : > { %4217 = vmatpush3.bf16.xpose.msk.msra.mxu1 %vm4675_vm2, %v5868_v60  ;;  %v6802_v60 = vld [vmem:[#allocation84_spill] sm:$0xff] }
 0x137   : > { %4220 = vmatprep.subr.msk.bf16.mxu1 %vm4675_vm2, %v5406_v28  ;;  %v370_v28 = vld [vmem:[%s4654_s22 + $0x508] sm:$0xff] }
 0x13c   : > { %4175 = vmatpush3.bf16.xpose.msk.msra.mxu0 %vm4675_vm2, %v5410_v31  ;;  %v371_v31 = vld [vmem:[%s4654_s22 + $0x510] sm:$0xff] }
 0x13d   : > { %4178 = vmatprep.subr.msk.bf16.mxu0 %vm4675_vm2, %v5418_v3  ;;  %v2224_v3 = vrot.slane %v370_v28, 1 }
 0x13e   : > { %4223 = vmatpush3.bf16.xpose.msk.msra.mxu1 %vm4675_vm2, %v5414_v57  ;;  %v2223_v57 = vrot.slane %v369_v13, 1 }
 0x13f   : > { %4226 = vmatprep.subr.msk.bf16.mxu1 %vm4675_vm2, %v5422_v38  ;;  %v2226_v38 = vrot.slane %v371_v31, 1 }
 0x144   : > { %4181 = vmatpush3.bf16.xpose.msk.msra.mxu0 %vm4675_vm2, %v5429_v39  ;;  %v4326_v39 = vpack.c.bf16 %v370_v28, %v369_v13  ;;  %v6809_v13 = vld [vmem:[#allocation91_spill] sm:$0xff]  ;;  %v6810_v28 = vld [vmem:[#allocation92_spill] sm:$0xff] }
 0x145   : > { %4184 = vmatprep.subr.msk.bf16.mxu0 %vm4675_vm2, %v6746_v49  ;;  %v6788_v49 = vld [vmem:[#allocation43_spill] sm:$0xff] }
 0x146   : > { %4229 = vmatpush3.bf16.xpose.msk.msra.mxu1 %vm4675_vm2, %v5433_v58  ;;  %v6200_v58 = vsel %vm535_vm1, %v2223_v57, %v2224_v3  ;;  %v6812_v57 = vld [vmem:[#allocation52_spill] sm:$0xff] }
 0x147   : > { %4232 = vmatprep.subr.msk.bf16.mxu1 %vm4675_vm2, %v5448_v4  ;;  %v6203_v4 = vsel %vm535_vm1, %v2224_v3, %v2226_v38  ;;  %v6813_v3 = vld [vmem:[#allocation53_spill] sm:$0xff] }
 0x14c   : > { %4187 = vmatpush3.bf16.xpose.msk.msra.mxu0 %vm4675_vm2, %v5697_v33  ;;  %v6781_v33 = vld [vmem:[#allocation36_spill] sm:$0xff] }
 0x14d   : > { %4190 = vmatprep.subr.msk.bf16.mxu0 %vm4675_vm2, %v6750_v46  ;;  %v6791_v46 = vld [vmem:[#allocation10_spill] sm:$0xff] }
 0x14e   : > { %4235 = vmatpush3.bf16.xpose.msk.msra.mxu1 %vm4675_vm2, %v5703_v35  ;;  %v6783_v35 = vld [vmem:[#allocation39_spill] sm:$0xff] }
 0x14f   : > { %4238 = vmatprep.subr.msk.bf16.mxu1 %vm4675_vm2, %v5469_v59  ;;  %v4518_v59 = vpack.c.bf16 %v6203_v4, %v6200_v58  ;;  %v6828_v58 = vld [vmem:[#allocation60_spill] sm:$0xff]  ;;  %v6829_v4 = vld [vmem:[#allocation61_spill] sm:$0xff] }
 0x154   : > { %4193 = vmatpush3.bf16.xpose.msk.msra.mxu0 %vm4675_vm2, %v5722_v1  ;;  %v6785_v1 = vld [vmem:[#allocation40_spill] sm:$0xff] }
 0x155   : > { %4244 = vmatprep.subr.msk.bf16.mxu0 %vm4675_vm2, %v5477_v30  ;;  %v372_v30 = vld [vmem:[%s4654_s22 + $0x518] sm:$0xff] }
 0x156   : > { %4241 = vmatpush3.bf16.xpose.msk.msra.mxu1 %vm4675_vm2, %v5735_v9  ;;  %v6787_v9 = vld [vmem:[#allocation42_spill] sm:$0xff] }
 0x157   : > { %4292 = vmatprep.subr.msk.bf16.mxu1 %vm4675_vm2, %v5481_v50  ;;  %v2228_v50 = vrot.slane %v372_v30, 1 }
 0x15b   : > { %3523 = vmatmul.mubr.msk.f32.vlgmr.msra.gmra.mrb[0].mxu0 %vm826_vm0, %v6013_v21 }
 0x15c   : > { %4247 = vmatpush3.bf16.xpose.msk.msra.mxu0 %vm4675_vm2, %v5497_v36  ;;  %3590 = vmatprep.mubr.msk.f32.mxu0 %vm826_vm0, %v6013_v21  ;;  %v4332_v36 = vpack.c.bf16 %v372_v30, %v371_v31  ;;  %v6811_v31 = vld [vmem:[#allocation45_spill] sm:$0xff]  ;;  %v6816_v30 = vld [vmem:[#allocation54_spill] sm:$0xff] }
 0x15d   : > { %3557 = vmatmul.mubr.msk.f32.vlgmr.msra.gmra.mrb[0].mxu1 %vm826_vm0, %v6013_v21  ;;  %4250 = vmatprep.subr.msk.bf16.mxu0 %vm4675_vm2, %v5505_v22 }
 0x15e   : > { %4295 = vmatpush3.bf16.xpose.msk.msra.mxu1 %vm4675_vm2, %v5501_v27  ;;  %3624 = vmatprep.mubr.msk.f32.mxu1 %vm826_vm0, %v6013_v21  ;;  %v6221_v27 = vsel %vm535_vm1, %v2226_v38, %v2228_v50  ;;  %v6814_v38 = vld [vmem:[#allocation65_spill] sm:$0xff] }
 0x15f   : > { %4298 = vmatprep.subr.msk.bf16.mxu1 %vm4675_vm2, %v5509_v17 }
 0x164   : > { %4253 = vmatpush3.bf16.xpose.msk.msra.mxu0 %vm4675_vm2, %v5517_v2  ;;  %v6769_v2 = vld [vmem:[#allocation15_spill] sm:$0xff] }
 0x165   : > { %4256 = vmatprep.subr.msk.bf16.mxu0 %vm4675_vm2, %v5525_v25  ;;  %v6771_v25 = vld [vmem:[#allocation17_spill] sm:$0xff] }
 0x166   : > { %4301 = vmatpush3.bf16.xpose.msk.msra.mxu1 %vm4675_vm2, %v5521_v54  ;;  %v6245_v54 = vld [vmem:[%s6482_s1 + $0x18] sm:$0xff] }
 0x167   : > { %4304 = vmatprep.subr.msk.bf16.mxu1 %vm4675_vm2, %v6760_v56  ;;  %v6803_v56 = vld [vmem:[#allocation86_spill] sm:$0xff] }
 0x16c   : > { %4259 = vmatpush3.bf16.xpose.msk.msra.mxu0 %vm4675_vm2, %v6761_v8  ;;  %v6804_v8 = vld [vmem:[#allocation85_spill] sm:$0xff] }
 0x16d   : > { %4262 = vmatprep.subr.msk.bf16.mxu0 %vm4675_vm2, %v6762_v24  ;;  %v6805_v24 = vld [vmem:[#allocation87_spill] sm:$0xff] }
 0x16e   : > { %4307 = vmatpush3.bf16.xpose.msk.msra.mxu1 %vm4675_vm2, %v6763_v11  ;;  %v6806_v11 = vld [vmem:[#allocation88_spill] sm:$0xff] }
 0x16f   : > { %4310 = vmatprep.subr.msk.bf16.mxu1 %vm4675_vm2, %v6764_v20  ;;  %v6807_v20 = vld [vmem:[#allocation90_spill] sm:$0xff] }
 0x174   : > { %4265 = vmatpush3.bf16.xpose.msk.msra.mxu0 %vm4675_vm2, %v6765_v32  ;;  %v6808_v32 = vld [vmem:[#allocation89_spill] sm:$0xff] }
 0x175   : > { %4268 = vmatprep.subr.msk.bf16.mxu0 %vm4675_vm2, %v5641_v40  ;;  %v6773_v40 = vld [vmem:[#allocation19_spill] sm:$0xff] }
 0x176   : > { %4313 = vmatpush3.bf16.xpose.msk.msra.mxu1 %vm4675_vm2, %v5625_v42  ;;  %v6772_v42 = vld [vmem:[#allocation18_spill] sm:$0xff] }
 0x177   : > { %4316 = vmatprep.subr.msk.bf16.mxu1 %vm4675_vm2, %v6766_v10  ;;  %v6774_v10 = vld [vmem:[#allocation23_spill] sm:$0xff] }
 0x17c   : > { %4271 = vmatpush3.bf16.xpose.msk.msra.mxu0 %vm4675_vm2, %v5652_v6  ;;  %v2537_v6 = vld [vmem:[%s6483_s2] sm:$0xff] }
 0x17d   : > { %4274 = vmatprep.subr.msk.bf16.mxu0 %vm4675_vm2, %v5680_v62  ;;  %v6777_v62 = vld [vmem:[#allocation30_spill] sm:$0xff] }
 0x17e   : > { %4319 = vmatpush3.bf16.xpose.msk.msra.mxu1 %vm4675_vm2, %v5669_v44  ;;  %v6776_v44 = vld [vmem:[#allocation29_spill] sm:$0xff] }
 0x17f   : > { %4322 = vmatprep.subr.msk.bf16.mxu1 %vm4675_vm2, %v5683_v14  ;;  %v6778_v14 = vld [vmem:[#allocation33_spill] sm:$0xff] }
 0x184   : > { %4277 = vmatpush3.bf16.xpose.msk.msra.mxu0 %vm4675_vm2, %v5691_v26  ;;  %v6779_v26 = vld [vmem:[#allocation34_spill] sm:$0xff] }
 0x185   : > { %4280 = vmatprep.subr.msk.bf16.mxu0 %vm4675_vm2, %v5452_v7  ;;  %v373_v7 = vld [vmem:[%s4654_s22 + $0x520] sm:$0x1] }
 0x186   : > { %4325 = vmatpush3.bf16.xpose.msk.msra.mxu1 %vm4675_vm2, %v5709_v23  ;;  %v2230_v22 = vrot.slane %v373_v7, 1  ;;  %v6784_v23 = vld [vmem:[#allocation38_spill] sm:$0xff]  ;;  %v6819_v7 = vld [vmem:[#allocation64_spill] sm:$0xff] }
 0x187   : > { %4328 = vmatprep.subr.msk.bf16.mxu1 %vm4675_vm2, %v4326_v39  ;;  %v6815_v39 = vld [vmem:[#allocation67_spill] sm:$0xff] }
 0x188   : > { %v6226_v17 = vsel %vm535_vm1, %v2228_v50, %v2230_v22  ;;  %v6817_v50 = vld [vmem:[#allocation69_spill] sm:$0xff] }
 0x189   : > { %v6820_v22 = vld [vmem:[#allocation73_spill] sm:$0xff] }
 0x18c   : > { %4283 = vmatpush3.bf16.xpose.msk.msra.mxu0 %vm4675_vm2, %v5437_v41  ;;  %v4524_v41 = vpack.c.bf16 %v6226_v17, %v6221_v27 }
 0x18d   : > { %4286 = vmatprep.subr.msk.bf16.mxu0 %vm4675_vm2, %v5473_v47  ;;  %v6767_v47 = vld [vmem:[#allocation14_spill] sm:$0xff] }
 0x18e   : > { %4331 = vmatpush3.bf16.xpose.msk.msra.mxu1 %vm4675_vm2, %v5441_v63  ;;  %v6768_v63 = vld [vmem:[#allocation93_spill] sm:$0xff] }
 0x18f   : > { %4334 = vmatprep.subr.msk.bf16.mxu1 %vm4675_vm2, %v4332_v36  ;;  %v6818_v36 = vld [vmem:[#allocation70_spill] sm:$0xff] }
 0x194   : > { %4289 = vmatpush3.bf16.xpose.msk.msra.mxu0 %vm4675_vm2, %v5456_v5  ;;  %v6770_v5 = vld [vmem:[#allocation16_spill] sm:$0xff] }
 0x195   : > { %4340 = vmatprep.subr.msk.bf16.mxu0 %vm4675_vm2, %v6767_v47  ;;  %v6821_v47 = vld [vmem:[#allocation68_spill] sm:$0xff] }
 0x196   : > { %4337 = vmatpush3.bf16.xpose.msk.msra.mxu1 %vm4675_vm2, %v6768_v63  ;;  %v6822_v63 = vld [vmem:[#allocation74_spill] sm:$0xff] }
 0x197   : > { %4388 = vmatprep.subr.msk.bf16.mxu1 %vm4675_vm2, %v6769_v2  ;;  %v6823_v2 = vld [vmem:[#allocation56_spill] sm:$0xff] }
 0x19b   : > { %3591 = vmatmul.mubr.msk.f32.vlgmr.msra.gmra.mrb[2].mxu0 %vm826_vm0, %v6013_v21 }
 0x19c   : > { %4343 = vmatpush3.bf16.xpose.msk.msra.mxu0 %vm4675_vm2, %v6770_v5  ;;  %3658 = vmatprep.mubr.msk.f32.mxu0 %vm826_vm0, %v6245_v54  ;;  %v6824_v5 = vld [vmem:[#allocation76_spill] sm:$0xff] }
 0x19d   : > { %3625 = vmatmul.mubr.msk.f32.vlgmr.msra.gmra.mrb[2].mxu1 %vm826_vm0, %v6013_v21  ;;  %4346 = vmatprep.subr.msk.bf16.mxu0 %vm4675_vm2, %v6771_v25  ;;  %v4605_v21 = vmov 0   ;;  %v6825_v25 = vld [vmem:[#allocation47_spill] sm:$0xff] }
 0x19e   : > { %4391 = vmatpush3.bf16.xpose.msk.msra.mxu1 %vm4675_vm2, %v6772_v42  ;;  %3692 = vmatprep.mubr.msk.f32.mxu1 %vm826_vm0, %v6245_v54  ;;  %v6827_v42 = vld [vmem:[#allocation49_spill] sm:$0xff] }
 0x19f   : > { %4394 = vmatprep.subr.msk.bf16.mxu1 %vm4675_vm2, %v6773_v40  ;;  %4564 = vset.pattern.permute.xlu0 %v4605_v21 }
 0x1a0   : > { %2540 = vperm.xlu0 %4564, %v2537_v6   ;;  %v6826_v6 = vld [vmem:[#allocation72_spill] sm:$0xff] }
 0x1a4   : > { %4349 = vmatpush3.bf16.xpose.msk.msra.mxu0 %vm4675_vm2, %v6774_v10 }
 0x1a5   : > { %4352 = vmatprep.subr.msk.bf16.mxu0 %vm4675_vm2, %v6775_v16 }
 0x1a6   : > { %4397 = vmatpush3.bf16.xpose.msk.msra.mxu1 %vm4675_vm2, %v6776_v44 }
 0x1a7   : > { %4400 = vmatprep.subr.msk.bf16.mxu1 %vm4675_vm2, %v6777_v62 }
 0x1ac   : > { %4355 = vmatpush3.bf16.xpose.msk.msra.mxu0 %vm4675_vm2, %v6778_v14 }
 0x1ad   : > { %4358 = vmatprep.subr.msk.bf16.mxu0 %vm4675_vm2, %v6779_v26 }
 0x1ae   : > { %4403 = vmatpush3.bf16.xpose.msk.msra.mxu1 %vm4675_vm2, %v6780_v61 }
 0x1af   : > { %4406 = vmatprep.subr.msk.bf16.mxu1 %vm4675_vm2, %v6781_v33 }
 0x1b4   : > { %4361 = vmatpush3.bf16.xpose.msk.msra.mxu0 %vm4675_vm2, %v6782_v55 }
 0x1b5   : > { %4364 = vmatprep.subr.msk.bf16.mxu0 %vm4675_vm2, %v6783_v35 }
 0x1b6   : > { %4409 = vmatpush3.bf16.xpose.msk.msra.mxu1 %vm4675_vm2, %v6784_v23 }
 0x1b7   : > { %4412 = vmatprep.subr.msk.bf16.mxu1 %vm4675_vm2, %v6785_v1 }
 0x1bc   : > { %4367 = vmatpush3.bf16.xpose.msk.msra.mxu0 %vm4675_vm2, %v6786_v12 }
 0x1bd   : > { %4370 = vmatprep.subr.msk.bf16.mxu0 %vm4675_vm2, %v6787_v9 }
 0x1be   : > { %4415 = vmatpush3.bf16.xpose.msk.msra.mxu1 %vm4675_vm2, %v6788_v49 }
 0x1bf   : > { %4418 = vmatprep.subr.msk.bf16.mxu1 %vm4675_vm2, %v6789_v48 }
 0x1c4   : > { %4373 = vmatpush3.bf16.xpose.msk.msra.mxu0 %vm4675_vm2, %v6790_v37 }
 0x1c5   : > { %4376 = vmatprep.subr.msk.bf16.mxu0 %vm4675_vm2, %v6791_v46 }
 0x1c6   : > { %4421 = vmatpush3.bf16.xpose.msk.msra.mxu1 %vm4675_vm2, %v6792_v43 }
 0x1c7   : > { %4424 = vmatprep.subr.msk.bf16.mxu1 %vm4675_vm2, %v6793_v53 }
 0x1cc   : > { %4379 = vmatpush3.bf16.xpose.msk.msra.mxu0 %vm4675_vm2, %v6794_v45 }
 0x1cd   : > { %4382 = vmatprep.subr.msk.bf16.mxu0 %vm4675_vm2, %v6795_v15 }
 0x1ce   : > { %4427 = vmatpush3.bf16.xpose.msk.msra.mxu1 %vm4675_vm2, %v6796_v29 }
 0x1cf   : > { %4430 = vmatprep.subr.msk.bf16.mxu1 %vm4675_vm2, %v6797_v52 }
 0x1d4   : > { %4385 = vmatpush3.bf16.xpose.msk.msra.mxu0 %vm4675_vm2, %v6798_v51 }
 0x1d5   : > { %4436 = vmatprep.subr.msk.bf16.mxu0 %vm4675_vm2, %v6799_v34 }
 0x1d6   : > { %4433 = vmatpush3.bf16.xpose.msk.msra.mxu1 %vm4675_vm2, %v6800_v19 }
 0x1d7   : > { %4484 = vmatprep.subr.msk.bf16.mxu1 %vm4675_vm2, %v6801_v0 }
 0x1db   : > { %3659 = vmatmul.mubr.msk.f32.vlgmr.msra.gmra.mrb[0].mxu0 %vm826_vm0, %v6245_v54 }
 0x1dc   : > { %4439 = vmatpush3.bf16.xpose.msk.msra.mxu0 %vm4675_vm2, %v6802_v60  ;;  %3726 = vmatprep.mubr.msk.f32.mxu0 %vm826_vm0, %v6245_v54 }
 0x1dd   : > { %3693 = vmatmul.mubr.msk.f32.vlgmr.msra.gmra.mrb[0].mxu1 %vm826_vm0, %v6245_v54  ;;  %4442 = vmatprep.subr.msk.bf16.mxu0 %vm4675_vm2, %v6803_v56 }
 0x1de   : > { %4487 = vmatpush3.bf16.xpose.msk.msra.mxu1 %vm4675_vm2, %v6804_v8  ;;  %3760 = vmatprep.mubr.msk.f32.mxu1 %vm826_vm0, %v6245_v54 }
 0x1df   : > { %4490 = vmatprep.subr.msk.bf16.mxu1 %vm4675_vm2, %v6805_v24 }
 0x1e4   : > { %4445 = vmatpush3.bf16.xpose.msk.msra.mxu0 %vm4675_vm2, %v6806_v11 }
 0x1e5   : > { %4448 = vmatprep.subr.msk.bf16.mxu0 %vm4675_vm2, %v6807_v20 }
 0x1e6   : > { %4493 = vmatpush3.bf16.xpose.msk.msra.mxu1 %vm4675_vm2, %v6808_v32 }
 0x1e7   : > { %4496 = vmatprep.subr.msk.bf16.mxu1 %vm4675_vm2, %v6809_v13 }
 0x1ec   : > { %4451 = vmatpush3.bf16.xpose.msk.msra.mxu0 %vm4675_vm2, %v6810_v28 }
 0x1ed   : > { %4454 = vmatprep.subr.msk.bf16.mxu0 %vm4675_vm2, %v6811_v31 }
 0x1ee   : > { %4499 = vmatpush3.bf16.xpose.msk.msra.mxu1 %vm4675_vm2, %v6812_v57 }
 0x1ef   : > { %4502 = vmatprep.subr.msk.bf16.mxu1 %vm4675_vm2, %v6813_v3 }
 0x1f4   : > { %4457 = vmatpush3.bf16.xpose.msk.msra.mxu0 %vm4675_vm2, %v6814_v38 }
 0x1f5   : > { %4460 = vmatprep.subr.msk.bf16.mxu0 %vm4675_vm2, %v6815_v39 }
 0x1f6   : > { %4505 = vmatpush3.bf16.xpose.msk.msra.mxu1 %vm4675_vm2, %v6816_v30 }
 0x1f7   : > { %4508 = vmatprep.subr.msk.bf16.mxu1 %vm4675_vm2, %v6817_v50 }
 0x1fc   : > { %4463 = vmatpush3.bf16.xpose.msk.msra.mxu0 %vm4675_vm2, %v6818_v36 }
 0x1fd   : > { %4466 = vmatprep.subr.msk.bf16.mxu0 %vm4675_vm2, %v6819_v7 }
 0x1fe   : > { %4511 = vmatpush3.bf16.xpose.msk.msra.mxu1 %vm4675_vm2, %v6820_v22 }
 0x1ff   : > { %4514 = vmatprep.subr.msk.bf16.mxu1 %vm4675_vm2, %v6821_v47 }
 0x204   : > { %4469 = vmatpush3.bf16.xpose.msk.msra.mxu0 %vm4675_vm2, %v6822_v63 }
 0x205   : > { %4472 = vmatprep.subr.msk.bf16.mxu0 %vm4675_vm2, %v6823_v2 }
 0x206   : > { %4517 = vmatpush3.bf16.xpose.msk.msra.mxu1 %vm4675_vm2, %v6824_v5 }
 0x207   : > { %4520 = vmatprep.subr.msk.bf16.mxu1 %vm4675_vm2, %v4518_v59 }
 0x20c   : > { %4475 = vmatpush3.bf16.xpose.msk.msra.mxu0 %vm4675_vm2, %v6825_v25 }
 0x20d   : > { %4478 = vmatprep.subr.msk.bf16.mxu0 %vm4675_vm2, %v6826_v6 }
 0x20e   : > { %4523 = vmatpush3.bf16.xpose.msk.msra.mxu1 %vm4675_vm2, %v6827_v42 }
 0x20f   : > { %4526 = vmatprep.subr.msk.bf16.mxu1 %vm4675_vm2, %v4524_v41 }
 0x214   : > { %4481 = vmatpush3.bf16.xpose.msk.msra.mxu0 %vm4675_vm2, %v6828_v58 }
 0x216   : > { %4529 = vmatpush3.bf16.xpose.msk.msra.mxu1 %vm4675_vm2, %v6829_v4 }
 0x21b   : > { %3727 = vmatmul.mubr.msk.f32.vlgmr.msra.gmra.mrb[2].mxu0 %vm826_vm0, %v6245_v54 }
 0x21d   : > { %3761 = vmatmul.mubr.msk.f32.vlgmr.msra.gmra.mrb[2].mxu1 %vm826_vm0, %v6245_v54 }
 0x21f   : > { %v2541_v59 = vpop.permute.xlu0 %2540 }
 0x2ae   : > { %v2311_v27 = vpop.f32.mrb[0].mxu0 }
 0x2af   : > { %v2543_v18 = vadd.f32 %v2541_v59, %v2311_v27  ;;  %v2313_v17 = vpop.f32.mrb[1].mxu0 }
 0x2b0   : > { %v2382_v41 = vpop.f32.mrb[0].mxu1  ;;  %v2544_v40 = vadd.f32 %v2541_v59, %v2313_v17 }
 0x2b1   : > { %2551 = vst [vmem:[%s6464_s10] sm:$0xff] %v2543_v18  ;;  %v2568_v21 = vmul.f32 %v2543_v18, %v2543_v18  ;;  %v2545_v10 = vadd.f32 %v2541_v59, %v2382_v41  ;;  %v2384_v54 = vpop.f32.mrb[1].mxu1 }
 0x2b2   : > { %2552 = vst [vmem:[%s6464_s10 + $0x8] sm:$0xff] %v2544_v40  ;;  %v2559_v16 = vadd.f32 %v2544_v40, %v2543_v18  ;;  %v2569_v44 = vmul.f32 %v2544_v40, %v2544_v40  ;;  %v2546_v62 = vadd.f32 %v2541_v59, %v2384_v54 }
 0x2b3   : > { %2553 = vst [vmem:[%s6464_s10 + $0x10] sm:$0xff] %v2545_v10  ;;  %v2570_v14 = vmul.f32 %v2545_v10, %v2545_v10 }
 0x2b4   : > { %v2576_v26 = vadd.f32 %v2569_v44, %v2568_v21  ;;  %2554 = vst [vmem:[%s6464_s10 + $0x18] sm:$0xff] %v2546_v62  ;;  %v2560_v61 = vadd.f32 %v2559_v16, %v2545_v10  ;;  %v2571_v55 = vmul.f32 %v2546_v62, %v2546_v62 }
 0x2b6   : > { %v2561_v33 = vadd.f32 %v2560_v61, %v2546_v62  ;;  %v2577_v35 = vadd.f32 %v2576_v26, %v2570_v14 }
 0x2b8   : > { %v2578_v23 = vadd.f32 %v2577_v35, %v2571_v55 }
 0x2ee   : > { %v2453_v1 = vpop.f32.mrb[2].mxu0 }
 0x2ef   : > { %v2547_v12 = vadd.f32 %v2541_v59, %v2453_v1  ;;  %v2455_v9 = vpop.f32.mrb[3].mxu0 }
 0x2f0   : > { %v2524_v49 = vpop.f32.mrb[2].mxu1  ;;  %v2548_v48 = vadd.f32 %v2541_v59, %v2455_v9 }
 0x2f1   : > { %2555 = vst [vmem:[%s6464_s10 + $0x20] sm:$0xff] %v2547_v12  ;;  %v2562_v37 = vadd.f32 %v2561_v33, %v2547_v12  ;;  %v2572_v46 = vmul.f32 %v2547_v12, %v2547_v12  ;;  %v2549_v43 = vadd.f32 %v2541_v59, %v2524_v49  ;;  %v2526_v53 = vpop.f32.mrb[3].mxu1 }
 0x2f2   : > { %2556 = vst [vmem:[%s6464_s10 + $0x28] sm:$0xff] %v2548_v48  ;;  %v2573_v45 = vmul.f32 %v2548_v48, %v2548_v48  ;;  %v2550_v15 = vadd.f32 %v2541_v59, %v2526_v53 }
 0x2f3   : > { %2557 = vst [vmem:[%s6464_s10 + $0x30] sm:$0xff] %v2549_v43  ;;  %v2563_v29 = vadd.f32 %v2562_v37, %v2548_v48  ;;  %v2579_v52 = vadd.f32 %v2578_v23, %v2572_v46  ;;  %v2574_v34 = vmul.f32 %v2549_v43, %v2549_v43 }
 0x2f4   : > { %2558 = vst [vmem:[%s6464_s10 + $0x38] sm:$0xff] %v2550_v15  ;;  %v2575_v60 = vmul.f32 %v2550_v15, %v2550_v15 }
 0x2f5   : > { %v2564_v51 = vadd.f32 %v2563_v29, %v2549_v43  ;;  %v2580_v19 = vadd.f32 %v2579_v52, %v2573_v45 }
 0x2f7   : > { %v2565_v0 = vadd.f32 %v2564_v51, %v2550_v15  ;;  %v2581_v56 = vadd.f32 %v2580_v19, %v2574_v34 }
 0x2f9   : > { %2566 = vadd.xlane.f32.xlu0 %v2565_v0  ;;  %v2582_v8 = vadd.f32 %v2581_v56, %v2575_v60 }
 0x2fb   : > { %2583 = vadd.xlane.f32.xlu1 %v2582_v8 }
 0x386   : > { %v2567_v24 = vpop.xlane.xlu0 %2566 }
 0x388   : > { %v2584_v11 = vpop.xlane.xlu1 %2583 }
 0x389   : > { %v2586_v20 = vsel %vm2585_vm3, %v2567_v24, %v2584_v11 }
 0x38a   : > { %2588 = vst.msk [vmem:[%s208_s14] sm:$0xff] %vm2587_vm4, %v2586_v20 }
 0x38b PF: > { %s15_s15 = sadd.s32 1, %s4603_s15  }
 0x38c   : > { %p12_p4 = scmp.ge.s32.totalorder %s15_s15, 4  }
 0x38e   :  { %14 = sbr.rel (!%p12_p4) target bundleno = 1 (0x1), region = 77 }

</bundles_post_ra>
